<compile_context>
chip_gen: v6e
topology: v6e:2x2x1
jax: 0.10.0
libtpu: 0.0.40
codegen_flags: <defaults>
</compile_context>

<pallas_src>
import jax
import jax.numpy as jnp
from jax.experimental import pallas as pl
from jax.experimental.pallas import tpu as pltpu


def _cls_head_kernel(
    x_ref, m_ref,                 # [tb, H] CLS features, [tb, F] manual feats
    wm_ref, bm_ref,               # manual_dense: [F, H] bf16, [1, H] f32
    w1x_ref, w1y_ref, b1_ref,     # dense1 split: [H, H] bf16 x2, [1, H] f32
    wh_ref, bh_ref,               # dense2..7 stacked: [6, H, H] bf16, [6, 1, H] f32
    wo_ref,                       # out_proj_new weight as a row: [1, H] bf16
    bo_ref,                       # out_proj_new bias: [1] f32 in SMEM
    out_ref,                      # output: [1, tb] f32 (lane-dense, batch on lanes)
):
    f32 = jnp.float32
    bf16 = jnp.bfloat16

    x = x_ref[...].astype(bf16)          # CLS token rows (no-op cast if already bf16)
    m = m_ref[...].astype(bf16)          # manual_features.float() -> bf16 for the MXU

    # y = tanh(manual_dense(m))          (f32 accumulation, f32 bias, f32 tanh)
    y = jnp.tanh(
        jnp.dot(m, wm_ref[...], preferred_element_type=f32) + bm_ref[...]
    )                                    # [tb, H] f32

    # dense1 on concat([x, y]) == x @ W1[:H] + y @ W1[H:] + b1
    h = (
        jnp.dot(x, w1x_ref[...], preferred_element_type=f32)
        + jnp.dot(y.astype(bf16), w1y_ref[...], preferred_element_type=f32)
        + b1_ref[...]
    )
    h = jnp.maximum(h, 0.0)

    # dense2 .. dense7, each followed by ReLU (dropout = identity at inference)
    for i in range(6):
        h = jnp.dot(h.astype(bf16), wh_ref[i], preferred_element_type=f32) + bh_ref[i]
        h = jnp.maximum(h, 0.0)

    # out_proj_new as VPU multiply + lane reduce (avoids a lane-sparse N=1 MXU matmul)
    logits = jnp.sum(h * wo_ref[...].astype(f32), axis=-1) + bo_ref[0]   # [tb]
    out_ref[...] = logits.reshape(1, -1).astype(out_ref.dtype)           # [1, tb]


def _round_up(x, m):
    return ((x + m - 1) // m) * m


def roberta_classification_head(features, manual_features, params):
    """features: [B, S, H]; manual_features: [B, F] (any numeric dtype)."""
    B, S, H = features.shape
    F = manual_features.shape[1]

    # ---- batch tiling: big MXU-filling tiles; pad B up when needed --------------
    if B <= 512:
        tb = max(8, _round_up(B, 8))           # one padded tile for small batches
    else:
        # Prefer the largest tile among {512, 256, 128} that minimizes padding.
        tb = min((512, 256, 128), key=lambda c: _round_up(B, c))
    B_pad = _round_up(B, tb)
    num_tiles = B_pad // tb
    grid = (num_tiles,)

    # ---- CLS-token slice: fuse into the x BlockSpec when layout allows ----------
    if H % 128 == 0 and B_pad == B:
        # View as [B, S*H]; the x BlockSpec DMAs only the first H lanes of each row.
        x_in = features.reshape(B, S * H)
    else:
        x_in = features[:, 0, :]
        if B_pad != B:
            x_in = jnp.pad(x_in, ((0, B_pad - B), (0, 0)))
    m_in = manual_features
    if B_pad != B:
        m_in = jnp.pad(m_in, ((0, B_pad - B), (0, 0)))

    x_spec = pl.BlockSpec((tb, H), lambda b: (b, 0))        # default Buffered(2)
    m_spec = pl.BlockSpec((tb, F), lambda b: (b, 0))
    out_spec = pl.BlockSpec((1, tb), lambda b: (0, b))      # lane-dense logits row

    vmem_weights = (
        params["wm"], params["bm"],
        params["w1x"], params["w1y"], params["b1"],
        params["wh"], params["bh"],
        params["wo_row"],
    )
    bo = params["bo"]                                       # (1,) f32 -> SMEM scalar

    def _resident_spec(arr, single_buffer):
        # Full-array block, constant index_map -> weight stays resident in VMEM.
        zeros = (0,) * arr.ndim
        idx = lambda b, z=zeros: z
        if single_buffer:
            try:
                return pl.BlockSpec(arr.shape, idx, pipeline_mode=pl.Buffered(1))
            except (TypeError, AttributeError):
                pass
        return pl.BlockSpec(arr.shape, idx)

    # ---- VMEM budget + cost estimate --------------------------------------------
    weight_bytes = sum(int(w.size) * w.dtype.itemsize for w in vmem_weights)
    act_tile_bytes = tb * (H * x_in.dtype.itemsize + F * m_in.dtype.itemsize)
    interm_bytes = 6 * tb * H * 4                     # f32 h/y live values headroom
    try:
        phys_vmem = int(pltpu.get_tpu_info().vmem_capacity_bytes)
    except Exception:
        phys_vmem = 64 << 20                          # conservative (v7x per-TC)
    vmem_cap = phys_vmem * 3 // 4                     # ~48 MiB v7x, ~96 MiB v5e/v6e

    flops = 2 * B_pad * (F * H + 8 * H * H + H)
    bytes_accessed = (
        weight_bytes
        + B_pad * H * x_in.dtype.itemsize
        + B_pad * F * m_in.dtype.itemsize
        + B_pad * 4
    )

    # Only worth sharding across TCs when there is >1 tile; on v7x each TC re-fetches
    # the full weight set, so tiny batches stay on one core anyway (grid == 1).
    dims = ("parallel",) if num_tiles > 1 else ("arbitrary",)

    def _run(single_buffer_weights):
        wmult = 1 if single_buffer_weights else 2
        vmem_limit = int(
            min(max(wmult * weight_bytes + 2 * act_tile_bytes + interm_bytes
                    + (8 << 20), 32 << 20), vmem_cap)
        )
        w_specs = [_resident_spec(w, single_buffer_weights) for w in vmem_weights]
        bo_spec = pl.BlockSpec(memory_space=pltpu.MemorySpace.SMEM)
        return pl.pallas_call(
            _cls_head_kernel,
            grid=grid,
            in_specs=[x_spec, m_spec] + w_specs + [bo_spec],
            out_specs=out_spec,
            out_shape=jax.ShapeDtypeStruct((1, B_pad), jnp.float32),
            compiler_params=pltpu.CompilerParams(
                dimension_semantics=dims,
                vmem_limit_bytes=vmem_limit,
            ),
            cost_estimate=pl.CostEstimate(
                flops=flops,
                transcendentals=B_pad * H,
                bytes_accessed=bytes_accessed,
            ),
        )(x_in, m_in, *vmem_weights, bo)

    try:
        out_row = _run(True)
    except Exception:
        # Fallback if this JAX build rejects pl.Buffered(1) on pallas_call inputs.
        out_row = _run(False)

    return out_row.reshape(-1)[:B].reshape(B, 1)


def make_params(key, feature_size, hidden_size):
    """Deterministic synthetic parameters.

    nn.Linear weights are stored pre-transposed as (in, out) so the kernel computes
    x @ W + b.  dense1's (2H -> H) weight is split into the x/y halves of the concat.
    out_proj_new's weight is stored as a [1, H] row (VPU dot).  Weights bf16, biases f32.
    """
    H, F = hidden_size, feature_size
    bf16, f32 = jnp.bfloat16, jnp.float32
    keys = iter(jax.random.split(key, 12))

    def init(shape, fan_in, dtype):
        bound = 1.0 / float(fan_in) ** 0.5
        return jax.random.uniform(next(keys), shape, jnp.float32, -bound, bound).astype(dtype)

    p = {}
    p["wm"] = init((F, H), F, bf16)               # manual_dense
    p["bm"] = init((1, H), F, f32)
    w1_full = init((2 * H, H), 2 * H, bf16)       # dense1 (in = 2H, out = H)
    p["w1x"] = w1_full[:H, :]
    p["w1y"] = w1_full[H:, :]
    p["b1"] = init((1, H), 2 * H, f32)
    p["wh"] = init((6, H, H), H, bf16)            # dense2 .. dense7 stacked
    p["bh"] = init((6, 1, H), H, f32)
    p["wo_row"] = init((1, H), H, bf16)           # out_proj_new weight as a row
    p["bo"] = init((1,), H, f32)                  # out_proj_new bias (SMEM scalar)
    return p


def _reference(features, manual_features, p):
    """Pure-JAX reference with identical mixed-precision semantics."""
    f32, bf16 = jnp.float32, jnp.bfloat16
    x = features[:, 0, :].astype(bf16)
    m = manual_features.astype(bf16)
    y = jnp.tanh(jnp.dot(m, p["wm"], preferred_element_type=f32) + p["bm"])
    h = jax.nn.relu(
        jnp.dot(x, p["w1x"], preferred_element_type=f32)
        + jnp.dot(y.astype(bf16), p["w1y"], preferred_element_type=f32)
        + p["b1"]
    )
    for i in range(6):
        h = jax.nn.relu(
            jnp.dot(h.astype(bf16), p["wh"][i], preferred_element_type=f32) + p["bh"][i]
        )
    return jnp.sum(h * p["wo_row"].astype(f32), axis=-1, keepdims=True) + p["bo"]


if __name__ == "__main__":
    # Small but layout-friendly smoke shapes. B=2 exercises the batch-padding /
    # wrapper-slice path; B=8 exercises the fused CLS-slice path (H % 128 == 0).
    S, H, F = 8, 128, 16
    key = jax.random.PRNGKey(0)
    k_feat, k_man, k_par = jax.random.split(key, 3)
    params = make_params(k_par, F, H)

    for B in (2, 8):
        kf = jax.random.fold_in(k_feat, B)
        km = jax.random.fold_in(k_man, B)
        features = jax.random.normal(kf, (B, S, H), jnp.float32)
        manual_features = jax.random.normal(km, (B, F), jnp.float32)

        out = roberta_classification_head(features, manual_features, params)
        out = jax.block_until_ready(out)

        ref = _reference(features, manual_features, params)
        assert out.shape == (B, 1), out.shape
        assert jnp.allclose(out, ref, atol=2e-2, rtol=2e-2), (out, ref)

    print("KERNEL_OK")
</pallas_src>

<mosaic_0001>
module attributes {stable_mosaic.version = 11 : i64} {
  func.func @_cls_head_kernel(%arg0: i32, %arg1: memref<8x128xf32, #tpu.memory_space<vmem>>, %arg2: memref<8x16xf32, #tpu.memory_space<vmem>>, %arg3: memref<16x128xbf16, #tpu.memory_space<vmem>>, %arg4: memref<1x128xf32, #tpu.memory_space<vmem>>, %arg5: memref<128x128xbf16, #tpu.memory_space<vmem>>, %arg6: memref<128x128xbf16, #tpu.memory_space<vmem>>, %arg7: memref<1x128xf32, #tpu.memory_space<vmem>>, %arg8: memref<6x128x128xbf16, #tpu.memory_space<vmem>>, %arg9: memref<6x1x128xf32, #tpu.memory_space<vmem>>, %arg10: memref<1x128xbf16, #tpu.memory_space<vmem>>, %arg11: memref<1xf32, #tpu.memory_space<smem>>, %arg12: memref<1x8xf32, #tpu.memory_space<vmem>>) attributes {dimension_semantics = [#tpu.dimension_semantics<arbitrary>], iteration_bounds = array<i64: 1>, scalar_prefetch = 0 : i64, scratch_operands = 0 : i64, tpu.core_type = #tpu.core_type<tc>, window_params = [{transform_indices = @transform_0, window_bounds = array<i64: 8, 128>}, {transform_indices = @transform_1, window_bounds = array<i64: 8, 16>}, {pipeline_mode = #tpu.pipeline_mode<synchronous>, transform_indices = @transform_2, window_bounds = array<i64: 16, 128>}, {pipeline_mode = #tpu.pipeline_mode<synchronous>, transform_indices = @transform_3, window_bounds = array<i64: 1, 128>}, {pipeline_mode = #tpu.pipeline_mode<synchronous>, transform_indices = @transform_4, window_bounds = array<i64: 128, 128>}, {pipeline_mode = #tpu.pipeline_mode<synchronous>, transform_indices = @transform_5, window_bounds = array<i64: 128, 128>}, {pipeline_mode = #tpu.pipeline_mode<synchronous>, transform_indices = @transform_6, window_bounds = array<i64: 1, 128>}, {pipeline_mode = #tpu.pipeline_mode<synchronous>, transform_indices = @transform_7, window_bounds = array<i64: 6, 128, 128>}, {pipeline_mode = #tpu.pipeline_mode<synchronous>, transform_indices = @transform_8, window_bounds = array<i64: 6, 1, 128>}, {pipeline_mode = #tpu.pipeline_mode<synchronous>, transform_indices = @transform_9, window_bounds = array<i64: 1, 128>}, {transform_indices = @transform_10, window_bounds = array<i64: 1>}, {transform_indices = @transform_11, window_bounds = array<i64: 1, 8>}]} {
    %c0 = arith.constant 0 : index
    %c0_0 = arith.constant 0 : index
    %0 = vector.load %arg1[%c0, %c0_0] : memref<8x128xf32, #tpu.memory_space<vmem>>, vector<8x128xf32>
    %1 = arith.truncf %0 : vector<8x128xf32> to vector<8x128xbf16>
    %c0_1 = arith.constant 0 : index
    %c0_2 = arith.constant 0 : index
    %2 = vector.load %arg2[%c0_1, %c0_2] : memref<8x16xf32, #tpu.memory_space<vmem>>, vector<8x16xf32>
    %3 = arith.truncf %2 : vector<8x16xf32> to vector<8x16xbf16>
    %c0_3 = arith.constant 0 : index
    %c0_4 = arith.constant 0 : index
    %4 = vector.load %arg3[%c0_3, %c0_4] : memref<16x128xbf16, #tpu.memory_space<vmem>>, vector<16x128xbf16>
    %cst = arith.constant dense<0.000000e+00> : vector<8x128xf32>
    %5 = tpu.matmul %3, %4, %cst {dimension_numbers = #tpu.dot_dimension_numbers<[1], [0], [0], [1], [0, 0, 1, 1], [], []>} : vector<8x16xbf16>, vector<16x128xbf16>, vector<8x128xf32> -> vector<8x128xf32>
    %c0_5 = arith.constant 0 : index
    %c0_6 = arith.constant 0 : index
    %6 = vector.load %arg4[%c0_5, %c0_6] : memref<1x128xf32, #tpu.memory_space<vmem>>, vector<1x128xf32>
    %7 = vector.broadcast %6 : vector<1x128xf32> to vector<8x128xf32>
    %8 = arith.addf %5, %7 : vector<8x128xf32>
    %9 = math.tanh %8 : vector<8x128xf32>
    %c0_7 = arith.constant 0 : index
    %c0_8 = arith.constant 0 : index
    %10 = vector.load %arg5[%c0_7, %c0_8] : memref<128x128xbf16, #tpu.memory_space<vmem>>, vector<128x128xbf16>
    %cst_9 = arith.constant dense<0.000000e+00> : vector<8x128xf32>
    %11 = tpu.matmul %1, %10, %cst_9 {dimension_numbers = #tpu.dot_dimension_numbers<[1], [0], [0], [1], [0, 0, 1, 1], [], []>} : vector<8x128xbf16>, vector<128x128xbf16>, vector<8x128xf32> -> vector<8x128xf32>
    %12 = arith.truncf %9 : vector<8x128xf32> to vector<8x128xbf16>
    %c0_10 = arith.constant 0 : index
    %c0_11 = arith.constant 0 : index
    %13 = vector.load %arg6[%c0_10, %c0_11] : memref<128x128xbf16, #tpu.memory_space<vmem>>, vector<128x128xbf16>
    %cst_12 = arith.constant dense<0.000000e+00> : vector<8x128xf32>
    %14 = tpu.matmul %12, %13, %cst_12 {dimension_numbers = #tpu.dot_dimension_numbers<[1], [0], [0], [1], [0, 0, 1, 1], [], []>} : vector<8x128xbf16>, vector<128x128xbf16>, vector<8x128xf32> -> vector<8x128xf32>
    %15 = arith.addf %11, %14 : vector<8x128xf32>
    %c0_13 = arith.constant 0 : index
    %c0_14 = arith.constant 0 : index
    %16 = vector.load %arg7[%c0_13, %c0_14] : memref<1x128xf32, #tpu.memory_space<vmem>>, vector<1x128xf32>
    %17 = vector.broadcast %16 : vector<1x128xf32> to vector<8x128xf32>
    %18 = arith.addf %15, %17 : vector<8x128xf32>
    %cst_15 = arith.constant 0.000000e+00 : f32
    %19 = vector.broadcast %cst_15 : f32 to vector<8x128xf32>
    %20 = arith.maximumf %18, %19 : vector<8x128xf32>
    %21 = arith.truncf %20 : vector<8x128xf32> to vector<8x128xbf16>
    %c0_16 = arith.constant 0 : index
    %c0_17 = arith.constant 0 : index
    %c0_18 = arith.constant 0 : index
    %22 = vector.load %arg8[%c0_16, %c0_17, %c0_18] : memref<6x128x128xbf16, #tpu.memory_space<vmem>>, vector<1x128x128xbf16>
    %23 = vector.shape_cast %22 : vector<1x128x128xbf16> to vector<128x128xbf16>
    %cst_19 = arith.constant dense<0.000000e+00> : vector<8x128xf32>
    %24 = tpu.matmul %21, %23, %cst_19 {dimension_numbers = #tpu.dot_dimension_numbers<[1], [0], [0], [1], [0, 0, 1, 1], [], []>} : vector<8x128xbf16>, vector<128x128xbf16>, vector<8x128xf32> -> vector<8x128xf32>
    %c0_20 = arith.constant 0 : index
    %c0_21 = arith.constant 0 : index
    %c0_22 = arith.constant 0 : index
    %25 = vector.load %arg9[%c0_20, %c0_21, %c0_22] : memref<6x1x128xf32, #tpu.memory_space<vmem>>, vector<1x1x128xf32>
    %26 = vector.shape_cast %25 : vector<1x1x128xf32> to vector<1x128xf32>
    %27 = vector.broadcast %26 : vector<1x128xf32> to vector<8x128xf32>
    %28 = arith.addf %24, %27 : vector<8x128xf32>
    %cst_23 = arith.constant 0.000000e+00 : f32
    %29 = vector.broadcast %cst_23 : f32 to vector<8x128xf32>
    %30 = arith.maximumf %28, %29 : vector<8x128xf32>
    %31 = arith.truncf %30 : vector<8x128xf32> to vector<8x128xbf16>
    %c1 = arith.constant 1 : index
    %c0_24 = arith.constant 0 : index
    %c0_25 = arith.constant 0 : index
    %32 = vector.load %arg8[%c1, %c0_24, %c0_25] : memref<6x128x128xbf16, #tpu.memory_space<vmem>>, vector<1x128x128xbf16>
    %33 = vector.shape_cast %32 : vector<1x128x128xbf16> to vector<128x128xbf16>
    %cst_26 = arith.constant dense<0.000000e+00> : vector<8x128xf32>
    %34 = tpu.matmul %31, %33, %cst_26 {dimension_numbers = #tpu.dot_dimension_numbers<[1], [0], [0], [1], [0, 0, 1, 1], [], []>} : vector<8x128xbf16>, vector<128x128xbf16>, vector<8x128xf32> -> vector<8x128xf32>
    %c1_27 = arith.constant 1 : index
    %c0_28 = arith.constant 0 : index
    %c0_29 = arith.constant 0 : index
    %35 = vector.load %arg9[%c1_27, %c0_28, %c0_29] : memref<6x1x128xf32, #tpu.memory_space<vmem>>, vector<1x1x128xf32>
    %36 = vector.shape_cast %35 : vector<1x1x128xf32> to vector<1x128xf32>
    %37 = vector.broadcast %36 : vector<1x128xf32> to vector<8x128xf32>
    %38 = arith.addf %34, %37 : vector<8x128xf32>
    %cst_30 = arith.constant 0.000000e+00 : f32
    %39 = vector.broadcast %cst_30 : f32 to vector<8x128xf32>
    %40 = arith.maximumf %38, %39 : vector<8x128xf32>
    %41 = arith.truncf %40 : vector<8x128xf32> to vector<8x128xbf16>
    %c2 = arith.constant 2 : index
    %c0_31 = arith.constant 0 : index
    %c0_32 = arith.constant 0 : index
    %42 = vector.load %arg8[%c2, %c0_31, %c0_32] : memref<6x128x128xbf16, #tpu.memory_space<vmem>>, vector<1x128x128xbf16>
    %43 = vector.shape_cast %42 : vector<1x128x128xbf16> to vector<128x128xbf16>
    %cst_33 = arith.constant dense<0.000000e+00> : vector<8x128xf32>
    %44 = tpu.matmul %41, %43, %cst_33 {dimension_numbers = #tpu.dot_dimension_numbers<[1], [0], [0], [1], [0, 0, 1, 1], [], []>} : vector<8x128xbf16>, vector<128x128xbf16>, vector<8x128xf32> -> vector<8x128xf32>
    %c2_34 = arith.constant 2 : index
    %c0_35 = arith.constant 0 : index
    %c0_36 = arith.constant 0 : index
    %45 = vector.load %arg9[%c2_34, %c0_35, %c0_36] : memref<6x1x128xf32, #tpu.memory_space<vmem>>, vector<1x1x128xf32>
    %46 = vector.shape_cast %45 : vector<1x1x128xf32> to vector<1x128xf32>
    %47 = vector.broadcast %46 : vector<1x128xf32> to vector<8x128xf32>
    %48 = arith.addf %44, %47 : vector<8x128xf32>
    %cst_37 = arith.constant 0.000000e+00 : f32
    %49 = vector.broadcast %cst_37 : f32 to vector<8x128xf32>
    %50 = arith.maximumf %48, %49 : vector<8x128xf32>
    %51 = arith.truncf %50 : vector<8x128xf32> to vector<8x128xbf16>
    %c3 = arith.constant 3 : index
    %c0_38 = arith.constant 0 : index
    %c0_39 = arith.constant 0 : index
    %52 = vector.load %arg8[%c3, %c0_38, %c0_39] : memref<6x128x128xbf16, #tpu.memory_space<vmem>>, vector<1x128x128xbf16>
    %53 = vector.shape_cast %52 : vector<1x128x128xbf16> to vector<128x128xbf16>
    %cst_40 = arith.constant dense<0.000000e+00> : vector<8x128xf32>
    %54 = tpu.matmul %51, %53, %cst_40 {dimension_numbers = #tpu.dot_dimension_numbers<[1], [0], [0], [1], [0, 0, 1, 1], [], []>} : vector<8x128xbf16>, vector<128x128xbf16>, vector<8x128xf32> -> vector<8x128xf32>
    %c3_41 = arith.constant 3 : index
    %c0_42 = arith.constant 0 : index
    %c0_43 = arith.constant 0 : index
    %55 = vector.load %arg9[%c3_41, %c0_42, %c0_43] : memref<6x1x128xf32, #tpu.memory_space<vmem>>, vector<1x1x128xf32>
    %56 = vector.shape_cast %55 : vector<1x1x128xf32> to vector<1x128xf32>
    %57 = vector.broadcast %56 : vector<1x128xf32> to vector<8x128xf32>
    %58 = arith.addf %54, %57 : vector<8x128xf32>
    %cst_44 = arith.constant 0.000000e+00 : f32
    %59 = vector.broadcast %cst_44 : f32 to vector<8x128xf32>
    %60 = arith.maximumf %58, %59 : vector<8x128xf32>
    %61 = arith.truncf %60 : vector<8x128xf32> to vector<8x128xbf16>
    %c4 = arith.constant 4 : index
    %c0_45 = arith.constant 0 : index
    %c0_46 = arith.constant 0 : index
    %62 = vector.load %arg8[%c4, %c0_45, %c0_46] : memref<6x128x128xbf16, #tpu.memory_space<vmem>>, vector<1x128x128xbf16>
    %63 = vector.shape_cast %62 : vector<1x128x128xbf16> to vector<128x128xbf16>
    %cst_47 = arith.constant dense<0.000000e+00> : vector<8x128xf32>
    %64 = tpu.matmul %61, %63, %cst_47 {dimension_numbers = #tpu.dot_dimension_numbers<[1], [0], [0], [1], [0, 0, 1, 1], [], []>} : vector<8x128xbf16>, vector<128x128xbf16>, vector<8x128xf32> -> vector<8x128xf32>
    %c4_48 = arith.constant 4 : index
    %c0_49 = arith.constant 0 : index
    %c0_50 = arith.constant 0 : index
    %65 = vector.load %arg9[%c4_48, %c0_49, %c0_50] : memref<6x1x128xf32, #tpu.memory_space<vmem>>, vector<1x1x128xf32>
    %66 = vector.shape_cast %65 : vector<1x1x128xf32> to vector<1x128xf32>
    %67 = vector.broadcast %66 : vector<1x128xf32> to vector<8x128xf32>
    %68 = arith.addf %64, %67 : vector<8x128xf32>
    %cst_51 = arith.constant 0.000000e+00 : f32
    %69 = vector.broadcast %cst_51 : f32 to vector<8x128xf32>
    %70 = arith.maximumf %68, %69 : vector<8x128xf32>
    %71 = arith.truncf %70 : vector<8x128xf32> to vector<8x128xbf16>
    %c5 = arith.constant 5 : index
    %c0_52 = arith.constant 0 : index
    %c0_53 = arith.constant 0 : index
    %72 = vector.load %arg8[%c5, %c0_52, %c0_53] : memref<6x128x128xbf16, #tpu.memory_space<vmem>>, vector<1x128x128xbf16>
    %73 = vector.shape_cast %72 : vector<1x128x128xbf16> to vector<128x128xbf16>
    %cst_54 = arith.constant dense<0.000000e+00> : vector<8x128xf32>
    %74 = tpu.matmul %71, %73, %cst_54 {dimension_numbers = #tpu.dot_dimension_numbers<[1], [0], [0], [1], [0, 0, 1, 1], [], []>} : vector<8x128xbf16>, vector<128x128xbf16>, vector<8x128xf32> -> vector<8x128xf32>
    %c5_55 = arith.constant 5 : index
    %c0_56 = arith.constant 0 : index
    %c0_57 = arith.constant 0 : index
    %75 = vector.load %arg9[%c5_55, %c0_56, %c0_57] : memref<6x1x128xf32, #tpu.memory_space<vmem>>, vector<1x1x128xf32>
    %76 = vector.shape_cast %75 : vector<1x1x128xf32> to vector<1x128xf32>
    %77 = vector.broadcast %76 : vector<1x128xf32> to vector<8x128xf32>
    %78 = arith.addf %74, %77 : vector<8x128xf32>
    %cst_58 = arith.constant 0.000000e+00 : f32
    %79 = vector.broadcast %cst_58 : f32 to vector<8x128xf32>
    %80 = arith.maximumf %78, %79 : vector<8x128xf32>
    %c0_59 = arith.constant 0 : index
    %c0_60 = arith.constant 0 : index
    %81 = vector.load %arg10[%c0_59, %c0_60] : memref<1x128xbf16, #tpu.memory_space<vmem>>, vector<1x128xbf16>
    %82 = arith.extf %81 : vector<1x128xbf16> to vector<1x128xf32>
    %83 = vector.broadcast %82 : vector<1x128xf32> to vector<8x128xf32>
    %84 = arith.mulf %80, %83 : vector<8x128xf32>
    %cst_61 = arith.constant dense<0.000000e+00> : vector<8xf32>
    %85 = vector.multi_reduction <add>, %84, %cst_61 [1] : vector<8x128xf32> to vector<8xf32>
    %c0_62 = arith.constant 0 : index
    %86 = memref.load %arg11[%c0_62] : memref<1xf32, #tpu.memory_space<smem>>
    %87 = vector.broadcast %86 : f32 to vector<8xf32>
    %88 = arith.addf %85, %87 : vector<8xf32>
    %89 = vector.shape_cast %88 : vector<8xf32> to vector<1x8xf32>
    %c0_63 = arith.constant 0 : index
    %c0_64 = arith.constant 0 : index
    %90 = vector.load %arg12[%c0_63, %c0_64] : memref<1x8xf32, #tpu.memory_space<vmem>>, vector<1x8xf32>
    tpu.vector_store %arg12[%c0_63, %c0_64], %89 {strides = array<i32>} : memref<1x8xf32, #tpu.memory_space<vmem>>, vector<1x8xf32>,
    return
  }
  func.func @transform_0(%arg0: i32) -> (i32, i32) {
    %c0_i32 = arith.constant 0 : i32
    %c0_i32_0 = arith.constant 0 : i32
    return %arg0, %c0_i32 : i32, i32
  }
  func.func @transform_1(%arg0: i32) -> (i32, i32) {
    %c0_i32 = arith.constant 0 : i32
    %c0_i32_0 = arith.constant 0 : i32
    return %arg0, %c0_i32 : i32, i32
  }
  func.func @transform_2(%arg0: i32) -> (i32, i32) {
    %c0_i32 = arith.constant 0 : i32
    %c0_i32_0 = arith.constant 0 : i32
    %c0_i32_1 = arith.constant 0 : i32
    return %c0_i32, %c0_i32_0 : i32, i32
  }
  func.func @transform_3(%arg0: i32) -> (i32, i32) {
    %c0_i32 = arith.constant 0 : i32
    %c0_i32_0 = arith.constant 0 : i32
    %c0_i32_1 = arith.constant 0 : i32
    return %c0_i32, %c0_i32_0 : i32, i32
  }
  func.func @transform_4(%arg0: i32) -> (i32, i32) {
    %c0_i32 = arith.constant 0 : i32
    %c0_i32_0 = arith.constant 0 : i32
    %c0_i32_1 = arith.constant 0 : i32
    return %c0_i32, %c0_i32_0 : i32, i32
  }
  func.func @transform_5(%arg0: i32) -> (i32, i32) {
    %c0_i32 = arith.constant 0 : i32
    %c0_i32_0 = arith.constant 0 : i32
    %c0_i32_1 = arith.constant 0 : i32
    return %c0_i32, %c0_i32_0 : i32, i32
  }
  func.func @transform_6(%arg0: i32) -> (i32, i32) {
    %c0_i32 = arith.constant 0 : i32
    %c0_i32_0 = arith.constant 0 : i32
    %c0_i32_1 = arith.constant 0 : i32
    return %c0_i32, %c0_i32_0 : i32, i32
  }
  func.func @transform_7(%arg0: i32) -> (i32, i32, i32) {
    %c0_i32 = arith.constant 0 : i32
    %c0_i32_0 = arith.constant 0 : i32
    %c0_i32_1 = arith.constant 0 : i32
    %c0_i32_2 = arith.constant 0 : i32
    return %c0_i32, %c0_i32_0, %c0_i32_1 : i32, i32, i32
  }
  func.func @transform_8(%arg0: i32) -> (i32, i32, i32) {
    %c0_i32 = arith.constant 0 : i32
    %c0_i32_0 = arith.constant 0 : i32
    %c0_i32_1 = arith.constant 0 : i32
    %c0_i32_2 = arith.constant 0 : i32
    return %c0_i32, %c0_i32_0, %c0_i32_1 : i32, i32, i32
  }
  func.func @transform_9(%arg0: i32) -> (i32, i32) {
    %c0_i32 = arith.constant 0 : i32
    %c0_i32_0 = arith.constant 0 : i32
    %c0_i32_1 = arith.constant 0 : i32
    return %c0_i32, %c0_i32_0 : i32, i32
  }
  func.func @transform_10(%arg0: i32) -> i32 {
    %c0_i32 = arith.constant 0 : i32
    %c0_i32_0 = arith.constant 0 : i32
    return %c0_i32 : i32
  }
  func.func @transform_11(%arg0: i32) -> (i32, i32) {
    %c0_i32 = arith.constant 0 : i32
    %c0_i32_0 = arith.constant 0 : i32
    return %c0_i32, %arg0 : i32, i32
  }
}

module attributes {stable_mosaic.version = 11 : i64} {
  func.func @_cls_head_kernel(%arg0: i32, %arg1: memref<8x128xf32, #tpu.memory_space<vmem>>, %arg2: memref<8x16xf32, #tpu.memory_space<vmem>>, %arg3: memref<16x128xbf16, #tpu.memory_space<vmem>>, %arg4: memref<1x128xf32, #tpu.memory_space<vmem>>, %arg5: memref<128x128xbf16, #tpu.memory_space<vmem>>, %arg6: memref<128x128xbf16, #tpu.memory_space<vmem>>, %arg7: memref<1x128xf32, #tpu.memory_space<vmem>>, %arg8: memref<6x128x128xbf16, #tpu.memory_space<vmem>>, %arg9: memref<6x1x128xf32, #tpu.memory_space<vmem>>, %arg10: memref<1x128xbf16, #tpu.memory_space<vmem>>, %arg11: memref<1xf32, #tpu.memory_space<smem>>, %arg12: memref<1x8xf32, #tpu.memory_space<vmem>>) attributes {dimension_semantics = [#tpu.dimension_semantics<arbitrary>], iteration_bounds = array<i64: 1>, scalar_prefetch = 0 : i64, scratch_operands = 0 : i64, tpu.core_type = #tpu.core_type<tc>, window_params = [{transform_indices = @transform_0, window_bounds = array<i64: 8, 128>}, {transform_indices = @transform_1, window_bounds = array<i64: 8, 16>}, {pipeline_mode = #tpu.pipeline_mode<synchronous>, transform_indices = @transform_2, window_bounds = array<i64: 16, 128>}, {pipeline_mode = #tpu.pipeline_mode<synchronous>, transform_indices = @transform_3, window_bounds = array<i64: 1, 128>}, {pipeline_mode = #tpu.pipeline_mode<synchronous>, transform_indices = @transform_4, window_bounds = array<i64: 128, 128>}, {pipeline_mode = #tpu.pipeline_mode<synchronous>, transform_indices = @transform_5, window_bounds = array<i64: 128, 128>}, {pipeline_mode = #tpu.pipeline_mode<synchronous>, transform_indices = @transform_6, window_bounds = array<i64: 1, 128>}, {pipeline_mode = #tpu.pipeline_mode<synchronous>, transform_indices = @transform_7, window_bounds = array<i64: 6, 128, 128>}, {pipeline_mode = #tpu.pipeline_mode<synchronous>, transform_indices = @transform_8, window_bounds = array<i64: 6, 1, 128>}, {pipeline_mode = #tpu.pipeline_mode<synchronous>, transform_indices = @transform_9, window_bounds = array<i64: 1, 128>}, {transform_indices = @transform_10, window_bounds = array<i64: 1>}, {transform_indices = @transform_11, window_bounds = array<i64: 1, 8>}]} {
    %c0 = arith.constant 0 : index
    %c0_0 = arith.constant 0 : index
    %0 = vector.load %arg1[%c0, %c0_0] : memref<8x128xf32, #tpu.memory_space<vmem>>, vector<8x128xf32>
    %1 = arith.truncf %0 : vector<8x128xf32> to vector<8x128xbf16>
    %c0_1 = arith.constant 0 : index
    %c0_2 = arith.constant 0 : index
    %2 = vector.load %arg2[%c0_1, %c0_2] : memref<8x16xf32, #tpu.memory_space<vmem>>, vector<8x16xf32>
    %3 = arith.truncf %2 : vector<8x16xf32> to vector<8x16xbf16>
    %c0_3 = arith.constant 0 : index
    %c0_4 = arith.constant 0 : index
    %4 = vector.load %arg3[%c0_3, %c0_4] : memref<16x128xbf16, #tpu.memory_space<vmem>>, vector<16x128xbf16>
    %cst = arith.constant dense<0.000000e+00> : vector<8x128xf32>
    %5 = tpu.matmul %3, %4, %cst {dimension_numbers = #tpu.dot_dimension_numbers<[1], [0], [0], [1], [0, 0, 1, 1], [], []>} : vector<8x16xbf16>, vector<16x128xbf16>, vector<8x128xf32> -> vector<8x128xf32>
    %c0_5 = arith.constant 0 : index
    %c0_6 = arith.constant 0 : index
    %6 = vector.load %arg4[%c0_5, %c0_6] : memref<1x128xf32, #tpu.memory_space<vmem>>, vector<1x128xf32>
    %7 = vector.broadcast %6 : vector<1x128xf32> to vector<8x128xf32>
    %8 = arith.addf %5, %7 : vector<8x128xf32>
    %9 = math.tanh %8 : vector<8x128xf32>
    %c0_7 = arith.constant 0 : index
    %c0_8 = arith.constant 0 : index
    %10 = vector.load %arg5[%c0_7, %c0_8] : memref<128x128xbf16, #tpu.memory_space<vmem>>, vector<128x128xbf16>
    %cst_9 = arith.constant dense<0.000000e+00> : vector<8x128xf32>
    %11 = tpu.matmul %1, %10, %cst_9 {dimension_numbers = #tpu.dot_dimension_numbers<[1], [0], [0], [1], [0, 0, 1, 1], [], []>} : vector<8x128xbf16>, vector<128x128xbf16>, vector<8x128xf32> -> vector<8x128xf32>
    %12 = arith.truncf %9 : vector<8x128xf32> to vector<8x128xbf16>
    %c0_10 = arith.constant 0 : index
    %c0_11 = arith.constant 0 : index
    %13 = vector.load %arg6[%c0_10, %c0_11] : memref<128x128xbf16, #tpu.memory_space<vmem>>, vector<128x128xbf16>
    %cst_12 = arith.constant dense<0.000000e+00> : vector<8x128xf32>
    %14 = tpu.matmul %12, %13, %cst_12 {dimension_numbers = #tpu.dot_dimension_numbers<[1], [0], [0], [1], [0, 0, 1, 1], [], []>} : vector<8x128xbf16>, vector<128x128xbf16>, vector<8x128xf32> -> vector<8x128xf32>
    %15 = arith.addf %11, %14 : vector<8x128xf32>
    %c0_13 = arith.constant 0 : index
    %c0_14 = arith.constant 0 : index
    %16 = vector.load %arg7[%c0_13, %c0_14] : memref<1x128xf32, #tpu.memory_space<vmem>>, vector<1x128xf32>
    %17 = vector.broadcast %16 : vector<1x128xf32> to vector<8x128xf32>
    %18 = arith.addf %15, %17 : vector<8x128xf32>
    %cst_15 = arith.constant 0.000000e+00 : f32
    %19 = vector.broadcast %cst_15 : f32 to vector<8x128xf32>
    %20 = arith.maximumf %18, %19 : vector<8x128xf32>
    %21 = arith.truncf %20 : vector<8x128xf32> to vector<8x128xbf16>
    %c0_16 = arith.constant 0 : index
    %c0_17 = arith.constant 0 : index
    %c0_18 = arith.constant 0 : index
    %22 = vector.load %arg8[%c0_16, %c0_17, %c0_18] : memref<6x128x128xbf16, #tpu.memory_space<vmem>>, vector<1x128x128xbf16>
    %23 = vector.shape_cast %22 : vector<1x128x128xbf16> to vector<128x128xbf16>
    %cst_19 = arith.constant dense<0.000000e+00> : vector<8x128xf32>
    %24 = tpu.matmul %21, %23, %cst_19 {dimension_numbers = #tpu.dot_dimension_numbers<[1], [0], [0], [1], [0, 0, 1, 1], [], []>} : vector<8x128xbf16>, vector<128x128xbf16>, vector<8x128xf32> -> vector<8x128xf32>
    %c0_20 = arith.constant 0 : index
    %c0_21 = arith.constant 0 : index
    %c0_22 = arith.constant 0 : index
    %25 = vector.load %arg9[%c0_20, %c0_21, %c0_22] : memref<6x1x128xf32, #tpu.memory_space<vmem>>, vector<1x1x128xf32>
    %26 = vector.shape_cast %25 : vector<1x1x128xf32> to vector<1x128xf32>
    %27 = vector.broadcast %26 : vector<1x128xf32> to vector<8x128xf32>
    %28 = arith.addf %24, %27 : vector<8x128xf32>
    %cst_23 = arith.constant 0.000000e+00 : f32
    %29 = vector.broadcast %cst_23 : f32 to vector<8x128xf32>
    %30 = arith.maximumf %28, %29 : vector<8x128xf32>
    %31 = arith.truncf %30 : vector<8x128xf32> to vector<8x128xbf16>
    %c1 = arith.constant 1 : index
    %c0_24 = arith.constant 0 : index
    %c0_25 = arith.constant 0 : index
    %32 = vector.load %arg8[%c1, %c0_24, %c0_25] : memref<6x128x128xbf16, #tpu.memory_space<vmem>>, vector<1x128x128xbf16>
    %33 = vector.shape_cast %32 : vector<1x128x128xbf16> to vector<128x128xbf16>
    %cst_26 = arith.constant dense<0.000000e+00> : vector<8x128xf32>
    %34 = tpu.matmul %31, %33, %cst_26 {dimension_numbers = #tpu.dot_dimension_numbers<[1], [0], [0], [1], [0, 0, 1, 1], [], []>} : vector<8x128xbf16>, vector<128x128xbf16>, vector<8x128xf32> -> vector<8x128xf32>
    %c1_27 = arith.constant 1 : index
    %c0_28 = arith.constant 0 : index
    %c0_29 = arith.constant 0 : index
    %35 = vector.load %arg9[%c1_27, %c0_28, %c0_29] : memref<6x1x128xf32, #tpu.memory_space<vmem>>, vector<1x1x128xf32>
    %36 = vector.shape_cast %35 : vector<1x1x128xf32> to vector<1x128xf32>
    %37 = vector.broadcast %36 : vector<1x128xf32> to vector<8x128xf32>
    %38 = arith.addf %34, %37 : vector<8x128xf32>
    %cst_30 = arith.constant 0.000000e+00 : f32
    %39 = vector.broadcast %cst_30 : f32 to vector<8x128xf32>
    %40 = arith.maximumf %38, %39 : vector<8x128xf32>
    %41 = arith.truncf %40 : vector<8x128xf32> to vector<8x128xbf16>
    %c2 = arith.constant 2 : index
    %c0_31 = arith.constant 0 : index
    %c0_32 = arith.constant 0 : index
    %42 = vector.load %arg8[%c2, %c0_31, %c0_32] : memref<6x128x128xbf16, #tpu.memory_space<vmem>>, vector<1x128x128xbf16>
    %43 = vector.shape_cast %42 : vector<1x128x128xbf16> to vector<128x128xbf16>
    %cst_33 = arith.constant dense<0.000000e+00> : vector<8x128xf32>
    %44 = tpu.matmul %41, %43, %cst_33 {dimension_numbers = #tpu.dot_dimension_numbers<[1], [0], [0], [1], [0, 0, 1, 1], [], []>} : vector<8x128xbf16>, vector<128x128xbf16>, vector<8x128xf32> -> vector<8x128xf32>
    %c2_34 = arith.constant 2 : index
    %c0_35 = arith.constant 0 : index
    %c0_36 = arith.constant 0 : index
    %45 = vector.load %arg9[%c2_34, %c0_35, %c0_36] : memref<6x1x128xf32, #tpu.memory_space<vmem>>, vector<1x1x128xf32>
    %46 = vector.shape_cast %45 : vector<1x1x128xf32> to vector<1x128xf32>
    %47 = vector.broadcast %46 : vector<1x128xf32> to vector<8x128xf32>
    %48 = arith.addf %44, %47 : vector<8x128xf32>
    %cst_37 = arith.constant 0.000000e+00 : f32
    %49 = vector.broadcast %cst_37 : f32 to vector<8x128xf32>
    %50 = arith.maximumf %48, %49 : vector<8x128xf32>
    %51 = arith.truncf %50 : vector<8x128xf32> to vector<8x128xbf16>
    %c3 = arith.constant 3 : index
    %c0_38 = arith.constant 0 : index
    %c0_39 = arith.constant 0 : index
    %52 = vector.load %arg8[%c3, %c0_38, %c0_39] : memref<6x128x128xbf16, #tpu.memory_space<vmem>>, vector<1x128x128xbf16>
    %53 = vector.shape_cast %52 : vector<1x128x128xbf16> to vector<128x128xbf16>
    %cst_40 = arith.constant dense<0.000000e+00> : vector<8x128xf32>
    %54 = tpu.matmul %51, %53, %cst_40 {dimension_numbers = #tpu.dot_dimension_numbers<[1], [0], [0], [1], [0, 0, 1, 1], [], []>} : vector<8x128xbf16>, vector<128x128xbf16>, vector<8x128xf32> -> vector<8x128xf32>
    %c3_41 = arith.constant 3 : index
    %c0_42 = arith.constant 0 : index
    %c0_43 = arith.constant 0 : index
    %55 = vector.load %arg9[%c3_41, %c0_42, %c0_43] : memref<6x1x128xf32, #tpu.memory_space<vmem>>, vector<1x1x128xf32>
    %56 = vector.shape_cast %55 : vector<1x1x128xf32> to vector<1x128xf32>
    %57 = vector.broadcast %56 : vector<1x128xf32> to vector<8x128xf32>
    %58 = arith.addf %54, %57 : vector<8x128xf32>
    %cst_44 = arith.constant 0.000000e+00 : f32
    %59 = vector.broadcast %cst_44 : f32 to vector<8x128xf32>
    %60 = arith.maximumf %58, %59 : vector<8x128xf32>
    %61 = arith.truncf %60 : vector<8x128xf32> to vector<8x128xbf16>
    %c4 = arith.constant 4 : index
    %c0_45 = arith.constant 0 : index
    %c0_46 = arith.constant 0 : index
    %62 = vector.load %arg8[%c4, %c0_45, %c0_46] : memref<6x128x128xbf16, #tpu.memory_space<vmem>>, vector<1x128x128xbf16>
    %63 = vector.shape_cast %62 : vector<1x128x128xbf16> to vector<128x128xbf16>
    %cst_47 = arith.constant dense<0.000000e+00> : vector<8x128xf32>
    %64 = tpu.matmul %61, %63, %cst_47 {dimension_numbers = #tpu.dot_dimension_numbers<[1], [0], [0], [1], [0, 0, 1, 1], [], []>} : vector<8x128xbf16>, vector<128x128xbf16>, vector<8x128xf32> -> vector<8x128xf32>
    %c4_48 = arith.constant 4 : index
    %c0_49 = arith.constant 0 : index
    %c0_50 = arith.constant 0 : index
    %65 = vector.load %arg9[%c4_48, %c0_49, %c0_50] : memref<6x1x128xf32, #tpu.memory_space<vmem>>, vector<1x1x128xf32>
    %66 = vector.shape_cast %65 : vector<1x1x128xf32> to vector<1x128xf32>
    %67 = vector.broadcast %66 : vector<1x128xf32> to vector<8x128xf32>
    %68 = arith.addf %64, %67 : vector<8x128xf32>
    %cst_51 = arith.constant 0.000000e+00 : f32
    %69 = vector.broadcast %cst_51 : f32 to vector<8x128xf32>
    %70 = arith.maximumf %68, %69 : vector<8x128xf32>
    %71 = arith.truncf %70 : vector<8x128xf32> to vector<8x128xbf16>
    %c5 = arith.constant 5 : index
    %c0_52 = arith.constant 0 : index
    %c0_53 = arith.constant 0 : index
    %72 = vector.load %arg8[%c5, %c0_52, %c0_53] : memref<6x128x128xbf16, #tpu.memory_space<vmem>>, vector<1x128x128xbf16>
    %73 = vector.shape_cast %72 : vector<1x128x128xbf16> to vector<128x128xbf16>
    %cst_54 = arith.constant dense<0.000000e+00> : vector<8x128xf32>
    %74 = tpu.matmul %71, %73, %cst_54 {dimension_numbers = #tpu.dot_dimension_numbers<[1], [0], [0], [1], [0, 0, 1, 1], [], []>} : vector<8x128xbf16>, vector<128x128xbf16>, vector<8x128xf32> -> vector<8x128xf32>
    %c5_55 = arith.constant 5 : index
    %c0_56 = arith.constant 0 : index
    %c0_57 = arith.constant 0 : index
    %75 = vector.load %arg9[%c5_55, %c0_56, %c0_57] : memref<6x1x128xf32, #tpu.memory_space<vmem>>, vector<1x1x128xf32>
    %76 = vector.shape_cast %75 : vector<1x1x128xf32> to vector<1x128xf32>
    %77 = vector.broadcast %76 : vector<1x128xf32> to vector<8x128xf32>
    %78 = arith.addf %74, %77 : vector<8x128xf32>
    %cst_58 = arith.constant 0.000000e+00 : f32
    %79 = vector.broadcast %cst_58 : f32 to vector<8x128xf32>
    %80 = arith.maximumf %78, %79 : vector<8x128xf32>
    %c0_59 = arith.constant 0 : index
    %c0_60 = arith.constant 0 : index
    %81 = vector.load %arg10[%c0_59, %c0_60] : memref<1x128xbf16, #tpu.memory_space<vmem>>, vector<1x128xbf16>
    %82 = arith.extf %81 : vector<1x128xbf16> to vector<1x128xf32>
    %83 = vector.broadcast %82 : vector<1x128xf32> to vector<8x128xf32>
    %84 = arith.mulf %80, %83 : vector<8x128xf32>
    %cst_61 = arith.constant dense<0.000000e+00> : vector<8xf32>
    %85 = vector.multi_reduction <add>, %84, %cst_61 [1] : vector<8x128xf32> to vector<8xf32>
    %c0_62 = arith.constant 0 : index
    %86 = memref.load %arg11[%c0_62] : memref<1xf32, #tpu.memory_space<smem>>
    %87 = vector.broadcast %86 : f32 to vector<8xf32>
    %88 = arith.addf %85, %87 : vector<8xf32>
    %89 = vector.shape_cast %88 : vector<8xf32> to vector<1x8xf32>
    %c0_63 = arith.constant 0 : index
    %c0_64 = arith.constant 0 : index
    %90 = vector.load %arg12[%c0_63, %c0_64] : memref<1x8xf32, #tpu.memory_space<vmem>>, vector<1x8xf32>
    tpu.vector_store %arg12[%c0_63, %c0_64], %89 {strides = array<i32>} : memref<1x8xf32, #tpu.memory_space<vmem>>, vector<1x8xf32>,
    return
  }
  func.func @transform_0(%arg0: i32) -> (i32, i32) {
    %c0_i32 = arith.constant 0 : i32
    %c0_i32_0 = arith.constant 0 : i32
    return %arg0, %c0_i32 : i32, i32
  }
  func.func @transform_1(%arg0: i32) -> (i32, i32) {
    %c0_i32 = arith.constant 0 : i32
    %c0_i32_0 = arith.constant 0 : i32
    return %arg0, %c0_i32 : i32, i32
  }
  func.func @transform_2(%arg0: i32) -> (i32, i32) {
    %c0_i32 = arith.constant 0 : i32
    %c0_i32_0 = arith.constant 0 : i32
    %c0_i32_1 = arith.constant 0 : i32
    return %c0_i32, %c0_i32_0 : i32, i32
  }
  func.func @transform_3(%arg0: i32) -> (i32, i32) {
    %c0_i32 = arith.constant 0 : i32
    %c0_i32_0 = arith.constant 0 : i32
    %c0_i32_1 = arith.constant 0 : i32
    return %c0_i32, %c0_i32_0 : i32, i32
  }
  func.func @transform_4(%arg0: i32) -> (i32, i32) {
    %c0_i32 = arith.constant 0 : i32
    %c0_i32_0 = arith.constant 0 : i32
    %c0_i32_1 = arith.constant 0 : i32
    return %c0_i32, %c0_i32_0 : i32, i32
  }
  func.func @transform_5(%arg0: i32) -> (i32, i32) {
    %c0_i32 = arith.constant 0 : i32
    %c0_i32_0 = arith.constant 0 : i32
    %c0_i32_1 = arith.constant 0 : i32
    return %c0_i32, %c0_i32_0 : i32, i32
  }
  func.func @transform_6(%arg0: i32) -> (i32, i32) {
    %c0_i32 = arith.constant 0 : i32
    %c0_i32_0 = arith.constant 0 : i32
    %c0_i32_1 = arith.constant 0 : i32
    return %c0_i32, %c0_i32_0 : i32, i32
  }
  func.func @transform_7(%arg0: i32) -> (i32, i32, i32) {
    %c0_i32 = arith.constant 0 : i32
    %c0_i32_0 = arith.constant 0 : i32
    %c0_i32_1 = arith.constant 0 : i32
    %c0_i32_2 = arith.constant 0 : i32
    return %c0_i32, %c0_i32_0, %c0_i32_1 : i32, i32, i32
  }
  func.func @transform_8(%arg0: i32) -> (i32, i32, i32) {
    %c0_i32 = arith.constant 0 : i32
    %c0_i32_0 = arith.constant 0 : i32
    %c0_i32_1 = arith.constant 0 : i32
    %c0_i32_2 = arith.constant 0 : i32
    return %c0_i32, %c0_i32_0, %c0_i32_1 : i32, i32, i32
  }
  func.func @transform_9(%arg0: i32) -> (i32, i32) {
    %c0_i32 = arith.constant 0 : i32
    %c0_i32_0 = arith.constant 0 : i32
    %c0_i32_1 = arith.constant 0 : i32
    return %c0_i32, %c0_i32_0 : i32, i32
  }
  func.func @transform_10(%arg0: i32) -> i32 {
    %c0_i32 = arith.constant 0 : i32
    %c0_i32_0 = arith.constant 0 : i32
    return %c0_i32 : i32
  }
  func.func @transform_11(%arg0: i32) -> (i32, i32) {
    %c0_i32 = arith.constant 0 : i32
    %c0_i32_0 = arith.constant 0 : i32
    return %c0_i32, %arg0 : i32, i32
  }
}

</mosaic_0001>

<bundles_post_ra>
// kernel: tpu_custom_call.1
= control target key start
LH: loop header
LB: loop body
LE: loop exit
PB: predicated region body
PF: predicated region fallthrough
CT: control target
= control target key end

     0   :  { %17 = vsyncpa [#allocation4], 0  ;;  %s1893_s0 = inlined_call_operand.hbm [shape: f32[8,128], index: 0, kind: input, shape index: {}]   ;;  %s1894_s1 = inlined_call_operand.hbm [shape: f32[8,16], index: 1, kind: input, shape index: {}]   ;;  %s1895_s2 = inlined_call_operand.hbm [shape: bf16[16,128], index: 2, kind: input, shape index: {}]   ;;  %s1896_s3 = inlined_call_operand.vmem [shape: f32[1,128], index: 3, kind: input, shape index: {}]   ;;  %s1897_s4 = inlined_call_operand.hbm [shape: bf16[128,128], index: 4, kind: input, shape index: {}]   ;;  %s1898_s5 = inlined_call_operand.hbm [shape: bf16[128,128], index: 5, kind: input, shape index: {}]   ;;  %s1899_s6 = inlined_call_operand.vmem [shape: f32[1,128], index: 6, kind: input, shape index: {}]   ;;  %s1900_s7 = inlined_call_operand.hbm [shape: bf16[6,128,128], index: 7, kind: input, shape index: {}]   ;;  %s1901_s8 = inlined_call_operand.vmem [shape: f32[6,1,128], index: 8, kind: input, shape index: {}]   ;;  %s1902_s9 = inlined_call_operand.vmem [shape: bf16[1,128], index: 9, kind: input, shape index: {}]   ;;  %s1903_s10 = inlined_call_operand.<no memory space> [shape: f32[1], index: 10, kind: input, shape index: {}]   ;;  %s1904_s11 = inlined_call_operand.hbm [shape: f32[1,8], index: 11, kind: output, shape index: {}]  }
   0x1   :  { %18 = vsyncpa [#allocation7], 0 }
   0x2   :  { %19 = vsyncpa [#allocation10], 0 }
   0x3   :  { %20 = vsyncpa [#allocation13], 0 }
   0x4   :  { %21 = vsyncpa [#allocation5], 0  ;;  %s1676_s17 = smov [#allocation6]  }
   0x5   :  { %s38_s18 = sshll.u32 %s1676_s17, 4  ;;  %s39_s18 = int_to_ptr.vmem [resolvable:$true] %s38_s18 }
   0x6   :  { %s1534_s19 = scalar_lea.vmem %s39_s18, 128  ;;  %p1539_p1 = scmp.lt.s32.totalorder %s39_s18, %s39_s18 }
   0x7   :  { %p1535_p0 = scmp.ne.s32.totalorder %s39_s18, %s1534_s19  ;;  %p1540_p2 = scmp.lt.s32.totalorder %s1534_s19, %s1534_s19 }
   0x9   :  { %p1541_p3 = por %p1540_p2, %p1539_p1 }
   0xb   :  { %p1542_p4 = pnand %p1541_p3, %p1535_p0 }
   0xd   :  { %1545 = shalt.err (!%p1542_p4)
}
   0xe   :  { %41 = dma.hbm_to_vmem [thread:$0]  %s1894_s1, 128, %s39_s18, [#allocation7]  }
   0xf   :  { %s1677_s22 = smov [#allocation9]   ;;  %s1678_s24 = smov [#allocation3]  }
  0x10   :  { %s61_s23 = sshll.u32 %s1677_s22, 4  ;;  %s28_s25 = sshll.u32 %s1678_s24, 4  ;;  %s62_s23 = int_to_ptr.vmem [resolvable:$true] %s61_s23  ;;  %s29_s25 = int_to_ptr.vmem [resolvable:$true] %s28_s25 }
  0x11   :  { %s1554_s26 = scalar_lea.vmem %s62_s23, 1024  ;;  %p1559_p6 = scmp.lt.s32.totalorder %s62_s23, %s62_s23 }
  0x12   :  { %p1555_p5 = scmp.ne.s32.totalorder %s62_s23, %s1554_s26  ;;  %p1560_p7 = scmp.lt.s32.totalorder %s1554_s26, %s1554_s26 }
  0x14   :  { %p1561_p8 = por %p1560_p7, %p1559_p6 }
  0x16   :  { %p1562_p9 = pnand %p1561_p8, %p1555_p5 }
  0x18   :  { %1565 = shalt.err (!%p1562_p9)
}
  0x19   :  { %s1679_s27 = smov 64   ;;  %s1680_s28 = smov 4  }
  0x1a   :  { %67 = dma.hbm_to_vmem [thread:$0]  %s1897_s4, 1024, %s62_s23, [#allocation10], %s1679_s27, %s1679_s27, %s1680_s28  }
  0x1b   :  { %s1574_s1 = scalar_lea.vmem %s29_s25, 128  ;;  %p1579_p11 = scmp.lt.s32.totalorder %s29_s25, %s29_s25 }
  0x1c   :  { %p1575_p10 = scmp.ne.s32.totalorder %s29_s25, %s1574_s1  ;;  %p1580_p12 = scmp.lt.s32.totalorder %s1574_s1, %s1574_s1 }
  0x1e   :  { %p1581_p13 = por %p1580_p12, %p1579_p11 }
  0x20   :  { %p1582_p0 = pnand %p1581_p13, %p1575_p10 }
  0x22   :  { %1585 = shalt.err (!%p1582_p0)
}
  0x23   :  { %31 = dma.hbm_to_vmem [thread:$0]  %s1893_s0, 128, %s29_s25, [#allocation4]  }
  0x24   :  { %s1681_s14 = smov [#allocation8]   ;;  %s1682_s16 = smov [#allocation11]  }
  0x25   :  { %s47_s15 = sshll.u32 %s1681_s14, 4  ;;  %s73_s17 = sshll.u32 %s1682_s16, 4  ;;  %s48_s15 = int_to_ptr.vmem [resolvable:$true] %s47_s15  ;;  %s74_s17 = int_to_ptr.vmem [resolvable:$true] %s73_s17 }
  0x26   :  { %s1594_s18 = scalar_lea.vmem %s48_s15, 128  ;;  %p1599_p2 = scmp.lt.s32.totalorder %s48_s15, %s48_s15 }
  0x27   :  { %p1595_p1 = scmp.ne.s32.totalorder %s48_s15, %s1594_s18  ;;  %p1600_p3 = scmp.lt.s32.totalorder %s1594_s18, %s1594_s18 }
  0x29   :  { %p1601_p4 = por %p1600_p3, %p1599_p2 }
  0x2b   :  { %p1602_p5 = pnand %p1601_p4, %p1595_p1 }
  0x2d   :  { %1605 = shalt.err (!%p1602_p5)
}
  0x2e   :  { %53 = dma.hbm_to_vmem [thread:$0]  %s1895_s2, 128, %s48_s15, [#allocation7], %s1679_s27, %s1679_s27, %s1680_s28  }
  0x2f   :  { %s1614_s0 = scalar_lea.vmem %s74_s17, 1024  ;;  %p1619_p7 = scmp.lt.s32.totalorder %s74_s17, %s74_s17 }
  0x30   :  { %p1615_p6 = scmp.ne.s32.totalorder %s74_s17, %s1614_s0  ;;  %p1620_p8 = scmp.lt.s32.totalorder %s1614_s0, %s1614_s0 }
  0x32   :  { %p1621_p9 = por %p1620_p8, %p1619_p7 }
  0x34   :  { %p1622_p10 = pnand %p1621_p9, %p1615_p6 }
  0x36   :  { %1625 = shalt.err (!%p1622_p10)
}
  0x37   :  { %79 = dma.hbm_to_vmem [thread:$0]  %s1898_s5, 1024, %s74_s17, [#allocation10], %s1679_s27, %s1679_s27, %s1680_s28  }
  0x38   :  { %s1683_s22 = smov [#allocation12]  }
  0x39   :  { %s87_s23 = sshll.u32 %s1683_s22, 4  ;;  %s88_s23 = int_to_ptr.vmem [resolvable:$true] %s87_s23 }
  0x3a   :  { %s1634_s24 = scalar_lea.vmem %s88_s23, 6144  ;;  %p1639_p12 = scmp.lt.s32.totalorder %s88_s23, %s88_s23 }
  0x3b   :  { %p1635_p11 = scmp.ne.s32.totalorder %s88_s23, %s1634_s24  ;;  %p1640_p13 = scmp.lt.s32.totalorder %s1634_s24, %s1634_s24 }
  0x3d   :  { %p1641_p0 = por %p1640_p13, %p1639_p12 }
  0x3f   :  { %p1642_p1 = pnand %p1641_p0, %p1635_p11 }
  0x41   :  { %1645 = shalt.err (!%p1642_p1)
}
  0x42   :  { %93 = dma.hbm_to_vmem [thread:$0]  %s1900_s7, 6144, %s88_s23, [#allocation13], %s1679_s27, %s1679_s27, %s1680_s28  }
  0x43   :  { %1666 = dma.done.wait [#allocation4], 128  }
  0x44   :  { %1667 = vsyncadd [#allocation4], 4294967168 }
  0x45   :  { %1668 = dma.done.wait [#allocation7], 256  }
  0x46   :  { %1669 = vsyncadd [#allocation7], 4294967040 }
  0x47   :  { %1670 = dma.done.wait [#allocation10], 2048  }
  0x48   :  { %1671 = vsyncadd [#allocation10], 4294965248 }
  0x49   :  { %1672 = dma.done.wait [#allocation13], 6144  }
  0x4a   :  { %1673 = vsyncadd [#allocation13], 4294961152  ;;  %v1684_v0 = vmov 0.0   ;;  %vm1685_vm0 = vmmov 0   ;;  %v1459_v1 = vld [vmem:[#allocation8] sm:$0xff]   ;;  %v121_v2 = vld [vmem:[#allocation6] sm:$0xff] }
  0x4b   :  { %1282 = vmatprep.subr.bf16.mxu0 %v1684_v0  ;;  %1284 = vmatprep.mubr.msk.bf16.mxu0 %vm1685_vm0, %v1684_v0  ;;  %v122_v3 = vpack.c.bf16 %v121_v2, %v121_v2  ;;  %vm138_vm1 = vcmask 130048   ;;  %v1460_v4 = vld [vmem:[#allocation9 + $0x38] sm:$0xff]   ;;  %v1461_v6 = vld [vmem:[#allocation9 + $0x30] sm:$0xff]   ;;  %v1463_v8 = vld [vmem:[#allocation9 + $0x28] sm:$0xff]   ;;  %vm1109_vm2 = vcmask 57344  }
  0x4c   :  { %1288 = vmatprep.subr.bf16.mxu1 %v1684_v0  ;;  %1304 = vmatprep.mubr.msk.bf16.mxu1 %vm1685_vm0, %v1684_v0  ;;  %v1462_v5 = vld [vmem:[#allocation11 + $0x38] sm:$0xff]   ;;  %v1464_v7 = vld [vmem:[#allocation11 + $0x30] sm:$0xff]   ;;  %v1466_v9 = vld [vmem:[#allocation11 + $0x28] sm:$0xff]  }
  0x4d   :  { %1283 = vmatpush3.bf16.msra.mxu0 %v1459_v1  ;;  %1289 = vmatpush3.bf16.msra.mxu1 %v1462_v5  ;;  %v1465_v10 = vld [vmem:[#allocation9 + $0x20] sm:$0xff]   ;;  %v1467_v11 = vld [vmem:[#allocation9 + $0x18] sm:$0xff]   ;;  %v1469_v13 = vld [vmem:[#allocation9 + $0x10] sm:$0xff]  }
  0x4e   :  { %1308 = vmatprep.subr.bf16.mxu0 %v1684_v0  ;;  %1290 = vmatprep.subr.bf16.mxu1 %v1684_v0  ;;  %v1468_v12 = vld [vmem:[#allocation11 + $0x20] sm:$0xff]   ;;  %v1470_v14 = vld [vmem:[#allocation11 + $0x18] sm:$0xff]   ;;  %v1471_v15 = vld [vmem:[#allocation9 + $0x8] sm:$0xff]  }
  0x4f   :  { %v1472_v16 = vld [vmem:[#allocation11 + $0x10] sm:$0xff]   ;;  %v1473_v17 = vld [vmem:[#allocation9] sm:$0xff]   ;;  %v119_v18 = vld [vmem:[#allocation3] sm:$0xff] }
  0x50   :  { %1285 = vmatmul.mubr.msk.bf16.vlgmr.msra.gmra.mxu0 %vm138_vm1, %v122_v3  ;;  %v1474_v19 = vld [vmem:[#allocation11 + $0x8] sm:$0xff]   ;;  %v120_v20 = vpack.c.bf16 %v119_v18, %v119_v18  ;;  %v1475_v21 = vld [vmem:[#allocation11] sm:$0xff]   ;;  %v1476_v29 = vld [vmem:[#allocation12 + $0x38] sm:$0xff]  }
  0x51   :  { %1309 = vmatpush3.bf16.msra.mxu0 %v1460_v4  ;;  %1324 = vmatprep.mubr.msk.bf16.mxu0 %vm1685_vm0, %v1684_v0  ;;  %v1129_v22 = vld [vmem:[%s1896_s3] ss:$0 sm:$0xff]  ;;  %v1477_v31 = vld [vmem:[#allocation12 + $0x30] sm:$0xff]   ;;  %v1479_v33 = vld [vmem:[#allocation12 + $0x20] sm:$0xff]  }
  0x52   :  { %1310 = vmatprep.subr.bf16.mxu0 %v1684_v0  ;;  %1291 = vmatpush3.bf16.msra.mxu1 %v1464_v7  ;;  %v1478_v32 = vld [vmem:[#allocation12 + $0x28] sm:$0xff]   ;;  %v1480_v34 = vld [vmem:[#allocation12 + $0x18] sm:$0xff]   ;;  %v1481_v35 = vld [vmem:[#allocation12 + $0x10] sm:$0xff]  }
  0x53   :  { %1292 = vmatprep.subr.bf16.mxu1 %v1684_v0  ;;  %v1482_v40 = vld [vmem:[#allocation12 + $0x8] sm:$0xff]   ;;  %v1483_v41 = vld [vmem:[#allocation12] sm:$0xff]   ;;  %v1484_v42 = vld [vmem:[#allocation12 + $0x78] sm:$0xff]  }
  0x54   :  { %v1485_v43 = vld [vmem:[#allocation12 + $0x70] sm:$0xff]   ;;  %v1486_v44 = vld [vmem:[#allocation12 + $0x68] sm:$0xff]   ;;  %v1487_v45 = vld [vmem:[#allocation12 + $0x60] sm:$0xff]  }
  0x55   :  { %1311 = vmatpush3.bf16.msra.mxu0 %v1461_v6  ;;  %v1488_v46 = vld [vmem:[#allocation12 + $0x58] sm:$0xff]   ;;  %v1489_v47 = vld [vmem:[#allocation12 + $0x50] sm:$0xff]   ;;  %v1148_v49 = vld [vmem:[%s1899_s6] ss:$0 sm:$0xff] }
  0x56   :  { %1312 = vmatprep.subr.bf16.mxu0 %v1684_v0  ;;  %1293 = vmatpush3.bf16.msra.mxu1 %v1466_v9  ;;  %v1490_v57 = vld [vmem:[#allocation12 + $0x48] sm:$0xff]   ;;  %v1491_v58 = vld [vmem:[#allocation12 + $0x40] sm:$0xff]   ;;  %v1492_v59 = vld [vmem:[#allocation12 + $0xb8] sm:$0xff]  }
  0x57   :  { %1294 = vmatprep.subr.bf16.mxu1 %v1684_v0  ;;  %v1493_v60 = vld [vmem:[#allocation12 + $0xb0] sm:$0xff]   ;;  %v1494_v61 = vld [vmem:[#allocation12 + $0xa8] sm:$0xff]   ;;  %v1495_v62 = vld [vmem:[#allocation12 + $0xa0] sm:$0xff]  }
  0x58   :  { %v1496_v63 = vld [vmem:[#allocation12 + $0x98] sm:$0xff]   ;;  %v1497_v1 = vld [vmem:[#allocation12 + $0x90] sm:$0xff]   ;;  %v1149_v2 = vld [vmem:[%s1901_s8] ss:$0 sm:$0xff] }
  0x59   :  { %1313 = vmatpush3.bf16.msra.mxu0 %v1463_v8  ;;  %v1159_v18 = vld [vmem:[%s1901_s8 + $0x1] ss:$0 sm:$0xff] }
  0x5a   :  { %1314 = vmatprep.subr.bf16.mxu0 %v1684_v0  ;;  %1295 = vmatpush3.bf16.msra.mxu1 %v1468_v12  ;;  %v1500_v12 = vld [vmem:[#allocation12 + $0xf8] sm:$0xff]  }
  0x5b   :  { %1296 = vmatprep.subr.bf16.mxu1 %v1684_v0 }
  0x5d   :  { %1315 = vmatpush3.bf16.msra.mxu0 %v1465_v10  ;;  %v1498_v10 = vld [vmem:[#allocation12 + $0x88] sm:$0xff]  }
  0x5e   :  { %1316 = vmatprep.subr.bf16.mxu0 %v1684_v0  ;;  %1297 = vmatpush3.bf16.msra.mxu1 %v1470_v14  ;;  %v1502_v14 = vld [vmem:[#allocation12 + $0xe8] sm:$0xff]  }
  0x5f   :  { %1298 = vmatprep.subr.bf16.mxu1 %v1684_v0 }
  0x61   :  { %1317 = vmatpush3.bf16.msra.mxu0 %v1467_v11  ;;  %v1499_v11 = vld [vmem:[#allocation12 + $0x80] sm:$0xff]  }
  0x62   :  { %1318 = vmatprep.subr.bf16.mxu0 %v1684_v0  ;;  %1299 = vmatpush3.bf16.msra.mxu1 %v1472_v16  ;;  %v1504_v16 = vld [vmem:[#allocation12 + $0xd8] sm:$0xff]  }
  0x63   :  { %1300 = vmatprep.subr.bf16.mxu1 %v1684_v0 }
  0x65   :  { %1319 = vmatpush3.bf16.msra.mxu0 %v1469_v13  ;;  %v1501_v13 = vld [vmem:[#allocation12 + $0xf0] sm:$0xff]  }
  0x66   :  { %1320 = vmatprep.subr.bf16.mxu0 %v1684_v0  ;;  %1301 = vmatpush3.bf16.msra.mxu1 %v1474_v19 }
  0x67   :  { %1302 = vmatprep.subr.bf16.mxu1 %v1684_v0 }
  0x69   :  { %1321 = vmatpush3.bf16.msra.mxu0 %v1471_v15  ;;  %v1503_v15 = vld [vmem:[#allocation12 + $0xe0] sm:$0xff]  }
  0x6a   :  { %1322 = vmatprep.subr.bf16.mxu0 %v1684_v0  ;;  %1303 = vmatpush3.bf16.msra.mxu1 %v1475_v21 }
  0x6b   :  { %1328 = vmatprep.subr.bf16.mxu1 %v1684_v0 }
  0x6d   :  { %1323 = vmatpush3.bf16.msra.mxu0 %v1473_v17  ;;  %v1505_v17 = vld [vmem:[#allocation12 + $0xd0] sm:$0xff]  }
  0x6e   :  { %1348 = vmatprep.subr.bf16.mxu0 %v1684_v0 }
  0x70   :  { %1325 = vmatmul.mubr.bf16.vlgmr.msra.gmra.mxu0 %v120_v20 }
  0x71   :  { %1364 = vmatprep.mubr.msk.bf16.mxu0 %vm1685_vm0, %v1684_v0  ;;  %1349 = vmatpush3.bf16.msra.mxu0 %v1484_v42  ;;  %v1514_v42 = vld [vmem:[#allocation12 + $0x108] sm:$0xff]  }
  0x72   :  { %1350 = vmatprep.subr.bf16.mxu0 %v1684_v0 }
  0x75   :  { %1351 = vmatpush3.bf16.msra.mxu0 %v1485_v43  ;;  %v1515_v43 = vld [vmem:[#allocation12 + $0x100] sm:$0xff]  }
  0x76   :  { %1352 = vmatprep.subr.bf16.mxu0 %v1684_v0 }
  0x79   :  { %1353 = vmatpush3.bf16.msra.mxu0 %v1486_v44  ;;  %v1516_v44 = vld [vmem:[#allocation12 + $0x178] sm:$0xff]  }
  0x7a   :  { %1354 = vmatprep.subr.bf16.mxu0 %v1684_v0 }
  0x7d   :  { %1355 = vmatpush3.bf16.msra.mxu0 %v1487_v45  ;;  %v1517_v45 = vld [vmem:[#allocation12 + $0x170] sm:$0xff]  }
  0x7e   :  { %1356 = vmatprep.subr.bf16.mxu0 %v1684_v0 }
  0x81   :  { %1357 = vmatpush3.bf16.msra.mxu0 %v1488_v46  ;;  %v1518_v46 = vld [vmem:[#allocation12 + $0x168] sm:$0xff]  }
  0x82   :  { %1358 = vmatprep.subr.bf16.mxu0 %v1684_v0 }
  0x85   :  { %1359 = vmatpush3.bf16.msra.mxu0 %v1489_v47  ;;  %v1519_v47 = vld [vmem:[#allocation12 + $0x160] sm:$0xff]  }
  0x86   :  { %1360 = vmatprep.subr.bf16.mxu0 %v1684_v0 }
  0x89   :  { %1361 = vmatpush3.bf16.msra.mxu0 %v1490_v57 }
  0x8a   :  { %1362 = vmatprep.subr.bf16.mxu0 %v1684_v0 }
  0x8d   :  { %1363 = vmatpush3.bf16.msra.mxu0 %v1491_v58  ;;  %v1522_v58 = vld [vmem:[#allocation12 + $0x148] sm:$0xff]  }
  0x8e   :  { %1388 = vmatprep.subr.bf16.mxu0 %v1684_v0 }
 0x110   :  { %v176_v23 = vpop.f32.mrf.mxu0 }
 0x111   :  { %v177_v24 = vadd.f32 %v1129_v22, %v176_v23 }
 0x112   :  { %v1286_v25 = vpop.f32.mrf.mxu0 }
 0x113   :  { %1524 = vtanh.f32 %v177_v24 }
 0x114   :  { %v179_v26 = vpop.f32.mrf.mxu0 }
 0x115   :  { %v1506_v26 = vld [vmem:[#allocation12 + $0xc8] sm:$0xff]  }
 0x116   :  { %v1287_v27 = vpop.f32.mrf.mxu0 }
 0x117   :  { %v1507_v27 = vld [vmem:[#allocation12 + $0xc0] sm:$0xff]  }
 0x120   :  { %v1525_v28 = vpop.eup %1524 }
 0x121   :  { %v199_v30 = vpack.c.bf16 %v1525_v28, %v1525_v28  ;;  %v1508_v28 = vld [vmem:[#allocation12 + $0x138] sm:$0xff]  }
 0x123   :  { %1305 = vmatmul.mubr.bf16.vlgmr.msra.gmra.mxu1 %v199_v30  ;;  %v1510_v30 = vld [vmem:[#allocation12 + $0x128] sm:$0xff]  }
 0x124   :  { %1329 = vmatpush3.bf16.msra.mxu1 %v1476_v29  ;;  %1344 = vmatprep.mubr.msk.bf16.mxu1 %vm1685_vm0, %v1684_v0  ;;  %v1509_v29 = vld [vmem:[#allocation12 + $0x130] sm:$0xff]  }
 0x125   :  { %1330 = vmatprep.subr.bf16.mxu1 %v1684_v0 }
 0x128   :  { %1331 = vmatpush3.bf16.msra.mxu1 %v1477_v31  ;;  %v1511_v31 = vld [vmem:[#allocation12 + $0x120] sm:$0xff]  }
 0x129   :  { %1332 = vmatprep.subr.bf16.mxu1 %v1684_v0 }
 0x12c   :  { %1333 = vmatpush3.bf16.msra.mxu1 %v1478_v32  ;;  %v1512_v32 = vld [vmem:[#allocation12 + $0x118] sm:$0xff]  }
 0x12d   :  { %1334 = vmatprep.subr.bf16.mxu1 %v1684_v0 }
 0x130   :  { %1335 = vmatpush3.bf16.msra.mxu1 %v1479_v33  ;;  %v386_v36 = vpop.f32.mrf.mxu0  ;;  %v1513_v33 = vld [vmem:[#allocation12 + $0x110] sm:$0xff]  }
 0x131   :  { %1336 = vmatprep.subr.bf16.mxu1 %v1684_v0 }
 0x132   :  { %v1326_v37 = vpop.f32.mrf.mxu0 }
 0x134   :  { %1337 = vmatpush3.bf16.msra.mxu1 %v1480_v34  ;;  %v389_v38 = vpop.f32.mrf.mxu0  ;;  %v1169_v34 = vld [vmem:[%s1901_s8 + $0x2] ss:$0 sm:$0xff] }
 0x135   :  { %1338 = vmatprep.subr.bf16.mxu1 %v1684_v0 }
 0x136   :  { %v1327_v39 = vpop.f32.mrf.mxu0 }
 0x138   :  { %1339 = vmatpush3.bf16.msra.mxu1 %v1481_v35 }
 0x139   :  { %1340 = vmatprep.subr.bf16.mxu1 %v1684_v0 }
 0x13c   :  { %1341 = vmatpush3.bf16.msra.mxu1 %v1482_v40 }
 0x13d   :  { %1342 = vmatprep.subr.bf16.mxu1 %v1684_v0 }
 0x140   :  { %1343 = vmatpush3.bf16.msra.mxu1 %v1483_v41 }
 0x141   :  { %1368 = vmatprep.subr.bf16.mxu1 %v1684_v0 }
 0x1e3   :  { %v298_v48 = vpop.f32.mrf.mxu1 }
 0x1e4   :  { %v387_v50 = vadd.f32 %v386_v36, %v298_v48  ;;  %v1520_v48 = vld [vmem:[#allocation12 + $0x158] sm:$0xff]  }
 0x1e5   :  { %v1306_v51 = vpop.f32.mrf.mxu1 }
 0x1e6   :  { %v399_v52 = vadd.f32 %v1148_v49, %v387_v50  ;;  %v1521_v49 = vld [vmem:[#allocation12 + $0x150] sm:$0xff]   ;;  %v1179_v50 = vld [vmem:[%s1901_s8 + $0x3] ss:$0 sm:$0xff] }
 0x1e7   :  { %v301_v53 = vpop.f32.mrf.mxu1 }
 0x1e8   :  { %v400_v54 = vmax.f32 %v399_v52, 0.0 }
 0x1e9   :  { %v1307_v55 = vpop.f32.mrf.mxu1 }
 0x1ea   :  { %v401_v56 = vpack.c.bf16 %v400_v54, %v400_v54 }
 0x1ec   :  { %1345 = vmatmul.mubr.bf16.vlgmr.msra.gmra.mxu1 %v401_v56 }
 0x1ed   :  { %1384 = vmatprep.mubr.msk.bf16.mxu1 %vm1685_vm0, %v1684_v0  ;;  %1369 = vmatpush3.bf16.msra.mxu1 %v1492_v59  ;;  %v1523_v59 = vld [vmem:[#allocation12 + $0x140] sm:$0xff]  }
 0x1ee   :  { %1370 = vmatprep.subr.bf16.mxu1 %v1684_v0 }
 0x1f1   :  { %1371 = vmatpush3.bf16.msra.mxu1 %v1493_v60  ;;  %v1189_v60 = vld [vmem:[%s1901_s8 + $0x4] ss:$0 sm:$0xff] }
 0x1f2   :  { %1372 = vmatprep.subr.bf16.mxu1 %v1684_v0 }
 0x1f5   :  { %1373 = vmatpush3.bf16.msra.mxu1 %v1494_v61 }
 0x1f6   :  { %1374 = vmatprep.subr.bf16.mxu1 %v1684_v0 }
 0x1f9   :  { %1375 = vmatpush3.bf16.msra.mxu1 %v1495_v62 }
 0x1fa   :  { %1376 = vmatprep.subr.bf16.mxu1 %v1684_v0 }
 0x1fd   :  { %1377 = vmatpush3.bf16.msra.mxu1 %v1496_v63 }
 0x1fe   :  { %1378 = vmatprep.subr.bf16.mxu1 %v1684_v0 }
 0x201   :  { %1379 = vmatpush3.bf16.msra.mxu1 %v1497_v1 }
 0x202   :  { %1380 = vmatprep.subr.bf16.mxu1 %v1684_v0 }
 0x205   :  { %1381 = vmatpush3.bf16.msra.mxu1 %v1498_v10 }
 0x206   :  { %1382 = vmatprep.subr.bf16.mxu1 %v1684_v0 }
 0x209   :  { %1383 = vmatpush3.bf16.msra.mxu1 %v1499_v11 }
 0x20a   :  { %1408 = vmatprep.subr.bf16.mxu1 %v1684_v0 }
 0x2ac   :  { %v507_v3 = vpop.f32.mrf.mxu1 }
 0x2ad   :  { %v508_v4 = vadd.f32 %v1149_v2, %v507_v3 }
 0x2ae   :  { %v1346_v5 = vpop.f32.mrf.mxu1 }
 0x2af   :  { %v513_v6 = vmax.f32 %v508_v4, 0.0  ;;  %v1091_v5 = vlaneseq }
 0x2b0   :  { %v510_v7 = vpop.f32.mrf.mxu1 }
 0x2b1   :  { %v514_v8 = vpack.c.bf16 %v513_v6, %v513_v6  ;;  %v1092_v6 = vshrl.u32 %v1091_v5, 7 }
 0x2b2   :  { %v1347_v9 = vpop.f32.mrf.mxu1 }
 0x2b3   :  { %1365 = vmatmul.mubr.bf16.vlgmr.msra.gmra.mxu0 %v514_v8  ;;  %v1093_v8 = vsub.s32 0, %v1092_v6  ;;  %v1199_v9 = vld [vmem:[%s1901_s8 + $0x5] ss:$0 sm:$0xff] }
 0x2b4   :  { %1404 = vmatprep.mubr.msk.bf16.mxu0 %vm1685_vm0, %v1684_v0  ;;  %1389 = vmatpush3.bf16.msra.mxu0 %v1500_v12 }
 0x2b5   :  { %1390 = vmatprep.subr.bf16.mxu0 %v1684_v0 }
 0x2b8   :  { %1391 = vmatpush3.bf16.msra.mxu0 %v1501_v13 }
 0x2b9   :  { %1392 = vmatprep.subr.bf16.mxu0 %v1684_v0 }
 0x2bc   :  { %1393 = vmatpush3.bf16.msra.mxu0 %v1502_v14 }
 0x2bd   :  { %1394 = vmatprep.subr.bf16.mxu0 %v1684_v0 }
 0x2c0   :  { %1395 = vmatpush3.bf16.msra.mxu0 %v1503_v15 }
 0x2c1   :  { %1396 = vmatprep.subr.bf16.mxu0 %v1684_v0 }
 0x2c4   :  { %1397 = vmatpush3.bf16.msra.mxu0 %v1504_v16 }
 0x2c5   :  { %1398 = vmatprep.subr.bf16.mxu0 %v1684_v0 }
 0x2c8   :  { %1399 = vmatpush3.bf16.msra.mxu0 %v1505_v17 }
 0x2c9   :  { %1400 = vmatprep.subr.bf16.mxu0 %v1684_v0 }
 0x2cc   :  { %1401 = vmatpush3.bf16.msra.mxu0 %v1506_v26 }
 0x2cd   :  { %1402 = vmatprep.subr.bf16.mxu0 %v1684_v0 }
 0x2d0   :  { %1403 = vmatpush3.bf16.msra.mxu0 %v1507_v27 }
 0x2d1   :  { %1428 = vmatprep.subr.bf16.mxu0 %v1684_v0 }
 0x373   :  { %v622_v19 = vpop.f32.mrf.mxu0 }
 0x374   :  { %v623_v20 = vadd.f32 %v1159_v18, %v622_v19  ;;  %v1103_v18 = vand.u32 127, %v1091_v5  ;;  %v1099_v19 = vstv %s1903_s10 }
 0x375   :  { %v1366_v21 = vpop.f32.mrf.mxu0 }
 0x376   :  { %v628_v22 = vmax.f32 %v623_v20, 0.0  ;;  %v1106_v20 = vsub.s32 %v1103_v18, %v1092_v6 }
 0x377   :  { %v625_v23 = vpop.f32.mrf.mxu0 }
 0x378   :  { %v629_v24 = vpack.c.bf16 %v628_v22, %v628_v22 }
 0x379   :  { %v1367_v25 = vpop.f32.mrf.mxu0 }
 0x37a   :  { %1385 = vmatmul.mubr.bf16.vlgmr.msra.gmra.mxu1 %v629_v24 }
 0x37b   :  { %1424 = vmatprep.mubr.msk.bf16.mxu1 %vm1685_vm0, %v1684_v0  ;;  %1409 = vmatpush3.bf16.msra.mxu1 %v1508_v28 }
 0x37c   :  { %1410 = vmatprep.subr.bf16.mxu1 %v1684_v0 }
 0x37f   :  { %1411 = vmatpush3.bf16.msra.mxu1 %v1509_v29 }
 0x380   :  { %1412 = vmatprep.subr.bf16.mxu1 %v1684_v0 }
 0x383   :  { %1413 = vmatpush3.bf16.msra.mxu1 %v1510_v30 }
 0x384   :  { %1414 = vmatprep.subr.bf16.mxu1 %v1684_v0 }
 0x387   :  { %1415 = vmatpush3.bf16.msra.mxu1 %v1511_v31 }
 0x388   :  { %1416 = vmatprep.subr.bf16.mxu1 %v1684_v0 }
 0x38b   :  { %1417 = vmatpush3.bf16.msra.mxu1 %v1512_v32 }
 0x38c   :  { %1418 = vmatprep.subr.bf16.mxu1 %v1684_v0 }
 0x38f   :  { %1419 = vmatpush3.bf16.msra.mxu1 %v1513_v33 }
 0x390   :  { %1420 = vmatprep.subr.bf16.mxu1 %v1684_v0 }
 0x393   :  { %1421 = vmatpush3.bf16.msra.mxu1 %v1514_v42 }
 0x394   :  { %1422 = vmatprep.subr.bf16.mxu1 %v1684_v0 }
 0x397   :  { %1423 = vmatpush3.bf16.msra.mxu1 %v1515_v43 }
 0x43a   :  { %v737_v35 = vpop.f32.mrf.mxu1 }
 0x43b   :  { %v738_v36 = vadd.f32 %v1169_v34, %v737_v35 }
 0x43c   :  { %v1386_v37 = vpop.f32.mrf.mxu1 }
 0x43d   :  { %v743_v38 = vmax.f32 %v738_v36, 0.0 }
 0x43e   :  { %v740_v39 = vpop.f32.mrf.mxu1 }
 0x43f   :  { %v744_v40 = vpack.c.bf16 %v743_v38, %v743_v38 }
 0x440   :  { %v1387_v41 = vpop.f32.mrf.mxu1 }
 0x441   :  { %1405 = vmatmul.mubr.bf16.vlgmr.msra.gmra.mxu0 %v744_v40 }
 0x442   :  { %1444 = vmatprep.mubr.msk.bf16.mxu0 %vm1685_vm0, %v1684_v0  ;;  %1429 = vmatpush3.bf16.msra.mxu0 %v1516_v44 }
 0x443   :  { %1430 = vmatprep.subr.bf16.mxu0 %v1684_v0 }
 0x446   :  { %1431 = vmatpush3.bf16.msra.mxu0 %v1517_v45 }
 0x447   :  { %1432 = vmatprep.subr.bf16.mxu0 %v1684_v0 }
 0x44a   :  { %1433 = vmatpush3.bf16.msra.mxu0 %v1518_v46 }
 0x44b   :  { %1434 = vmatprep.subr.bf16.mxu0 %v1684_v0 }
 0x44e   :  { %1435 = vmatpush3.bf16.msra.mxu0 %v1519_v47 }
 0x44f   :  { %1436 = vmatprep.subr.bf16.mxu0 %v1684_v0 }
 0x452   :  { %1437 = vmatpush3.bf16.msra.mxu0 %v1520_v48 }
 0x453   :  { %1438 = vmatprep.subr.bf16.mxu0 %v1684_v0 }
 0x456   :  { %1439 = vmatpush3.bf16.msra.mxu0 %v1521_v49 }
 0x457   :  { %1440 = vmatprep.subr.bf16.mxu0 %v1684_v0 }
 0x45a   :  { %1441 = vmatpush3.bf16.msra.mxu0 %v1522_v58 }
 0x45b   :  { %1442 = vmatprep.subr.bf16.mxu0 %v1684_v0  ;;  %v1089_v0 = vld [vmem:[%s1902_s9] sm:$0x1]  ;;  %s1686_s9 = smov [#allocation14]  }
 0x45c   :  { %v1090_v7 = vunpack.c.l.bf16 %v1089_v0  ;;  %s1117_s20 = sshll.u32 %s1686_s9, 4  ;;  %s1118_s20 = int_to_ptr.vmem [resolvable:$true] %s1117_s20 }
 0x45d   :  { %s1646_s8 = scalar_lea.vmem %s1118_s20, 16  ;;  %s1650_s21 = scalar_lea.vmem %s1118_s20, 32 }
 0x45e   :  { %1443 = vmatpush3.bf16.msra.mxu0 %v1523_v59  ;;  %v1094_v12 = vrot.slane %v1090_v7, %v1093_v8  ;;  %p1647_p2 = scmp.ne.s32.totalorder %s1118_s20, %s1646_s8  ;;  %p1651_p3 = scmp.lt.s32.totalorder %s1118_s20, %s1118_s20 }
 0x45f   :  { %p1652_p4 = scmp.lt.s32.totalorder %s1650_s21, %s1646_s8 }
 0x461   :  { %p1653_p5 = por %p1652_p4, %p1651_p3 }
 0x463   :  { %p1654_p6 = pnand %p1653_p5, %p1647_p2 }
 0x501   :  { %v852_v51 = vpop.f32.mrf.mxu0 }
 0x502   :  { %v853_v52 = vadd.f32 %v1179_v50, %v852_v51 }
 0x503   :  { %v1406_v53 = vpop.f32.mrf.mxu0 }
 0x504   :  { %v858_v54 = vmax.f32 %v853_v52, 0.0 }
 0x505   :  { %v855_v55 = vpop.f32.mrf.mxu0 }
 0x506   :  { %v859_v56 = vpack.c.bf16 %v858_v54, %v858_v54 }
 0x507   :  { %v1407_v57 = vpop.f32.mrf.mxu0 }
 0x508   :  { %1425 = vmatmul.mubr.bf16.vlgmr.msra.gmra.mxu1 %v859_v56 }
 0x5c8   :  { %v967_v61 = vpop.f32.mrf.mxu1 }
 0x5c9   :  { %v968_v62 = vadd.f32 %v1189_v60, %v967_v61 }
 0x5ca   :  { %v1426_v63 = vpop.f32.mrf.mxu1 }
 0x5cb   :  { %v973_v1 = vmax.f32 %v968_v62, 0.0 }
 0x5cc   :  { %v970_v2 = vpop.f32.mrf.mxu1 }
 0x5cd   :  { %v974_v3 = vpack.c.bf16 %v973_v1, %v973_v1 }
 0x5ce   :  { %v1427_v4 = vpop.f32.mrf.mxu1 }
 0x5cf   :  { %1445 = vmatmul.mubr.bf16.vlgmr.msra.gmra.mxu0 %v974_v3 }
 0x68f   :  { %v1082_v10 = vpop.f32.mrf.mxu0 }
 0x690   :  { %v1083_v11 = vadd.f32 %v1199_v9, %v1082_v10 }
 0x691   :  { %v1446_v13 = vpop.f32.mrf.mxu0 }
 0x692   :  { %v1088_v14 = vmax.f32 %v1083_v11, 0.0 }
 0x693   :  { %v1085_v15 = vpop.f32.mrf.mxu0 }
 0x694   :  { %v1095_v16 = vmul.f32 %v1094_v12, %v1088_v14 }
 0x695   :  { %v1447_v17 = vpop.f32.mrf.mxu0 }
 0x696   :  { %1096 = vadd.xlane.f32.xlu0 %v1095_v16 }
 0x71f   :  { %v1097_v21 = vpop.xlane.xlu0 %1096 }
 0x720   :  { %v1100_v22 = vadd.f32 %v1099_v19, %v1097_v21 }
 0x722   :  { %v1107_v23 = vrot.slane %v1100_v22, %v1106_v20 }
 0x724   :  { %1110 = vst.msk [vmem:[#allocation14] sm:$0x1] %vm1109_vm2, %v1107_v23 }
 0x725   :  { %1657 = shalt.err (!%p1654_p6)
}
 0x726   :  { %1120 = dma.vmem_to_hbm [thread:$0]  %s1118_s20, 16, %s1904_s11, [#allocation5]  }
 0x727   :  { %1674 = dma.done.wait [#allocation5], 16  }
 0x728   :  { %1675 = vsyncadd [#allocation5], 4294967280 }
 0x729   :  { %1124 = vsyncpa [#allocation4], 1 }
 0x72a   :  { %1125 = vsyncpa [#allocation7], 1 }
 0x72b   :  { %1126 = vsyncpa [#allocation10], 1 }
 0x72c   :  { %1127 = vsyncpa [#allocation13], 1 }
 0x72d   :  { %1128 = vsyncpa [#allocation5], 1 }

// kernel: tpu_custom_call.1
= control target key start
LH: loop header
LB: loop body
LE: loop exit
PB: predicated region body
PF: predicated region fallthrough
CT: control target
= control target key end

     0   :  { %17 = vsyncpa [#allocation4], 0  ;;  %s1893_s0 = inlined_call_operand.hbm [shape: f32[8,128], index: 0, kind: input, shape index: {}]   ;;  %s1894_s1 = inlined_call_operand.hbm [shape: f32[8,16], index: 1, kind: input, shape index: {}]   ;;  %s1895_s2 = inlined_call_operand.hbm [shape: bf16[16,128], index: 2, kind: input, shape index: {}]   ;;  %s1896_s3 = inlined_call_operand.vmem [shape: f32[1,128], index: 3, kind: input, shape index: {}]   ;;  %s1897_s4 = inlined_call_operand.hbm [shape: bf16[128,128], index: 4, kind: input, shape index: {}]   ;;  %s1898_s5 = inlined_call_operand.hbm [shape: bf16[128,128], index: 5, kind: input, shape index: {}]   ;;  %s1899_s6 = inlined_call_operand.vmem [shape: f32[1,128], index: 6, kind: input, shape index: {}]   ;;  %s1900_s7 = inlined_call_operand.hbm [shape: bf16[6,128,128], index: 7, kind: input, shape index: {}]   ;;  %s1901_s8 = inlined_call_operand.vmem [shape: f32[6,1,128], index: 8, kind: input, shape index: {}]   ;;  %s1902_s9 = inlined_call_operand.vmem [shape: bf16[1,128], index: 9, kind: input, shape index: {}]   ;;  %s1903_s10 = inlined_call_operand.<no memory space> [shape: f32[1], index: 10, kind: input, shape index: {}]   ;;  %s1904_s11 = inlined_call_operand.hbm [shape: f32[1,8], index: 11, kind: output, shape index: {}]  }
   0x1   :  { %18 = vsyncpa [#allocation7], 0 }
   0x2   :  { %19 = vsyncpa [#allocation10], 0 }
   0x3   :  { %20 = vsyncpa [#allocation13], 0 }
   0x4   :  { %21 = vsyncpa [#allocation5], 0  ;;  %s1676_s17 = smov [#allocation6]  }
   0x5   :  { %s38_s18 = sshll.u32 %s1676_s17, 4  ;;  %s39_s18 = int_to_ptr.vmem [resolvable:$true] %s38_s18 }
   0x6   :  { %s1534_s19 = scalar_lea.vmem %s39_s18, 128  ;;  %p1539_p1 = scmp.lt.s32.totalorder %s39_s18, %s39_s18 }
   0x7   :  { %p1535_p0 = scmp.ne.s32.totalorder %s39_s18, %s1534_s19  ;;  %p1540_p2 = scmp.lt.s32.totalorder %s1534_s19, %s1534_s19 }
   0x9   :  { %p1541_p3 = por %p1540_p2, %p1539_p1 }
   0xb   :  { %p1542_p4 = pnand %p1541_p3, %p1535_p0 }
   0xd   :  { %1545 = shalt.err (!%p1542_p4)
}
   0xe   :  { %41 = dma.hbm_to_vmem [thread:$0]  %s1894_s1, 128, %s39_s18, [#allocation7]  }
   0xf   :  { %s1677_s22 = smov [#allocation9]   ;;  %s1678_s24 = smov [#allocation3]  }
  0x10   :  { %s61_s23 = sshll.u32 %s1677_s22, 4  ;;  %s28_s25 = sshll.u32 %s1678_s24, 4  ;;  %s62_s23 = int_to_ptr.vmem [resolvable:$true] %s61_s23  ;;  %s29_s25 = int_to_ptr.vmem [resolvable:$true] %s28_s25 }
  0x11   :  { %s1554_s26 = scalar_lea.vmem %s62_s23, 1024  ;;  %p1559_p6 = scmp.lt.s32.totalorder %s62_s23, %s62_s23 }
  0x12   :  { %p1555_p5 = scmp.ne.s32.totalorder %s62_s23, %s1554_s26  ;;  %p1560_p7 = scmp.lt.s32.totalorder %s1554_s26, %s1554_s26 }
  0x14   :  { %p1561_p8 = por %p1560_p7, %p1559_p6 }
  0x16   :  { %p1562_p9 = pnand %p1561_p8, %p1555_p5 }
  0x18   :  { %1565 = shalt.err (!%p1562_p9)
}
  0x19   :  { %s1679_s27 = smov 64   ;;  %s1680_s28 = smov 4  }
  0x1a   :  { %67 = dma.hbm_to_vmem [thread:$0]  %s1897_s4, 1024, %s62_s23, [#allocation10], %s1679_s27, %s1679_s27, %s1680_s28  }
  0x1b   :  { %s1574_s1 = scalar_lea.vmem %s29_s25, 128  ;;  %p1579_p11 = scmp.lt.s32.totalorder %s29_s25, %s29_s25 }
  0x1c   :  { %p1575_p10 = scmp.ne.s32.totalorder %s29_s25, %s1574_s1  ;;  %p1580_p12 = scmp.lt.s32.totalorder %s1574_s1, %s1574_s1 }
  0x1e   :  { %p1581_p13 = por %p1580_p12, %p1579_p11 }
  0x20   :  { %p1582_p0 = pnand %p1581_p13, %p1575_p10 }
  0x22   :  { %1585 = shalt.err (!%p1582_p0)
}
  0x23   :  { %31 = dma.hbm_to_vmem [thread:$0]  %s1893_s0, 128, %s29_s25, [#allocation4]  }
  0x24   :  { %s1681_s14 = smov [#allocation8]   ;;  %s1682_s16 = smov [#allocation11]  }
  0x25   :  { %s47_s15 = sshll.u32 %s1681_s14, 4  ;;  %s73_s17 = sshll.u32 %s1682_s16, 4  ;;  %s48_s15 = int_to_ptr.vmem [resolvable:$true] %s47_s15  ;;  %s74_s17 = int_to_ptr.vmem [resolvable:$true] %s73_s17 }
  0x26   :  { %s1594_s18 = scalar_lea.vmem %s48_s15, 128  ;;  %p1599_p2 = scmp.lt.s32.totalorder %s48_s15, %s48_s15 }
  0x27   :  { %p1595_p1 = scmp.ne.s32.totalorder %s48_s15, %s1594_s18  ;;  %p1600_p3 = scmp.lt.s32.totalorder %s1594_s18, %s1594_s18 }
  0x29   :  { %p1601_p4 = por %p1600_p3, %p1599_p2 }
  0x2b   :  { %p1602_p5 = pnand %p1601_p4, %p1595_p1 }
  0x2d   :  { %1605 = shalt.err (!%p1602_p5)
}
  0x2e   :  { %53 = dma.hbm_to_vmem [thread:$0]  %s1895_s2, 128, %s48_s15, [#allocation7], %s1679_s27, %s1679_s27, %s1680_s28  }
  0x2f   :  { %s1614_s0 = scalar_lea.vmem %s74_s17, 1024  ;;  %p1619_p7 = scmp.lt.s32.totalorder %s74_s17, %s74_s17 }
  0x30   :  { %p1615_p6 = scmp.ne.s32.totalorder %s74_s17, %s1614_s0  ;;  %p1620_p8 = scmp.lt.s32.totalorder %s1614_s0, %s1614_s0 }
  0x32   :  { %p1621_p9 = por %p1620_p8, %p1619_p7 }
  0x34   :  { %p1622_p10 = pnand %p1621_p9, %p1615_p6 }
  0x36   :  { %1625 = shalt.err (!%p1622_p10)
}
  0x37   :  { %79 = dma.hbm_to_vmem [thread:$0]  %s1898_s5, 1024, %s74_s17, [#allocation10], %s1679_s27, %s1679_s27, %s1680_s28  }
  0x38   :  { %s1683_s22 = smov [#allocation12]  }
  0x39   :  { %s87_s23 = sshll.u32 %s1683_s22, 4  ;;  %s88_s23 = int_to_ptr.vmem [resolvable:$true] %s87_s23 }
  0x3a   :  { %s1634_s24 = scalar_lea.vmem %s88_s23, 6144  ;;  %p1639_p12 = scmp.lt.s32.totalorder %s88_s23, %s88_s23 }
  0x3b   :  { %p1635_p11 = scmp.ne.s32.totalorder %s88_s23, %s1634_s24  ;;  %p1640_p13 = scmp.lt.s32.totalorder %s1634_s24, %s1634_s24 }
  0x3d   :  { %p1641_p0 = por %p1640_p13, %p1639_p12 }
  0x3f   :  { %p1642_p1 = pnand %p1641_p0, %p1635_p11 }
  0x41   :  { %1645 = shalt.err (!%p1642_p1)
}
  0x42   :  { %93 = dma.hbm_to_vmem [thread:$0]  %s1900_s7, 6144, %s88_s23, [#allocation13], %s1679_s27, %s1679_s27, %s1680_s28  }
  0x43   :  { %1666 = dma.done.wait [#allocation4], 128  }
  0x44   :  { %1667 = vsyncadd [#allocation4], 4294967168 }
  0x45   :  { %1668 = dma.done.wait [#allocation7], 256  }
  0x46   :  { %1669 = vsyncadd [#allocation7], 4294967040 }
  0x47   :  { %1670 = dma.done.wait [#allocation10], 2048  }
  0x48   :  { %1671 = vsyncadd [#allocation10], 4294965248 }
  0x49   :  { %1672 = dma.done.wait [#allocation13], 6144  }
  0x4a   :  { %1673 = vsyncadd [#allocation13], 4294961152  ;;  %v1684_v0 = vmov 0.0   ;;  %vm1685_vm0 = vmmov 0   ;;  %v1459_v1 = vld [vmem:[#allocation8] sm:$0xff]   ;;  %v121_v2 = vld [vmem:[#allocation6] sm:$0xff] }
  0x4b   :  { %1282 = vmatprep.subr.bf16.mxu0 %v1684_v0  ;;  %1284 = vmatprep.mubr.msk.bf16.mxu0 %vm1685_vm0, %v1684_v0  ;;  %v122_v3 = vpack.c.bf16 %v121_v2, %v121_v2  ;;  %vm138_vm1 = vcmask 130048   ;;  %v1460_v4 = vld [vmem:[#allocation9 + $0x38] sm:$0xff]   ;;  %v1461_v6 = vld [vmem:[#allocation9 + $0x30] sm:$0xff]   ;;  %v1463_v8 = vld [vmem:[#allocation9 + $0x28] sm:$0xff]   ;;  %vm1109_vm2 = vcmask 57344  }
  0x4c   :  { %1288 = vmatprep.subr.bf16.mxu1 %v1684_v0  ;;  %1304 = vmatprep.mubr.msk.bf16.mxu1 %vm1685_vm0, %v1684_v0  ;;  %v1462_v5 = vld [vmem:[#allocation11 + $0x38] sm:$0xff]   ;;  %v1464_v7 = vld [vmem:[#allocation11 + $0x30] sm:$0xff]   ;;  %v1466_v9 = vld [vmem:[#allocation11 + $0x28] sm:$0xff]  }
  0x4d   :  { %1283 = vmatpush3.bf16.msra.mxu0 %v1459_v1  ;;  %1289 = vmatpush3.bf16.msra.mxu1 %v1462_v5  ;;  %v1465_v10 = vld [vmem:[#allocation9 + $0x20] sm:$0xff]   ;;  %v1467_v11 = vld [vmem:[#allocation9 + $0x18] sm:$0xff]   ;;  %v1469_v13 = vld [vmem:[#allocation9 + $0x10] sm:$0xff]  }
  0x4e   :  { %1308 = vmatprep.subr.bf16.mxu0 %v1684_v0  ;;  %1290 = vmatprep.subr.bf16.mxu1 %v1684_v0  ;;  %v1468_v12 = vld [vmem:[#allocation11 + $0x20] sm:$0xff]   ;;  %v1470_v14 = vld [vmem:[#allocation11 + $0x18] sm:$0xff]   ;;  %v1471_v15 = vld [vmem:[#allocation9 + $0x8] sm:$0xff]  }
  0x4f   :  { %v1472_v16 = vld [vmem:[#allocation11 + $0x10] sm:$0xff]   ;;  %v1473_v17 = vld [vmem:[#allocation9] sm:$0xff]   ;;  %v119_v18 = vld [vmem:[#allocation3] sm:$0xff] }
  0x50   :  { %1285 = vmatmul.mubr.msk.bf16.vlgmr.msra.gmra.mxu0 %vm138_vm1, %v122_v3  ;;  %v1474_v19 = vld [vmem:[#allocation11 + $0x8] sm:$0xff]   ;;  %v120_v20 = vpack.c.bf16 %v119_v18, %v119_v18  ;;  %v1475_v21 = vld [vmem:[#allocation11] sm:$0xff]   ;;  %v1476_v29 = vld [vmem:[#allocation12 + $0x38] sm:$0xff]  }
  0x51   :  { %1309 = vmatpush3.bf16.msra.mxu0 %v1460_v4  ;;  %1324 = vmatprep.mubr.msk.bf16.mxu0 %vm1685_vm0, %v1684_v0  ;;  %v1129_v22 = vld [vmem:[%s1896_s3] ss:$0 sm:$0xff]  ;;  %v1477_v31 = vld [vmem:[#allocation12 + $0x30] sm:$0xff]   ;;  %v1479_v33 = vld [vmem:[#allocation12 + $0x20] sm:$0xff]  }
  0x52   :  { %1310 = vmatprep.subr.bf16.mxu0 %v1684_v0  ;;  %1291 = vmatpush3.bf16.msra.mxu1 %v1464_v7  ;;  %v1478_v32 = vld [vmem:[#allocation12 + $0x28] sm:$0xff]   ;;  %v1480_v34 = vld [vmem:[#allocation12 + $0x18] sm:$0xff]   ;;  %v1481_v35 = vld [vmem:[#allocation12 + $0x10] sm:$0xff]  }
  0x53   :  { %1292 = vmatprep.subr.bf16.mxu1 %v1684_v0  ;;  %v1482_v40 = vld [vmem:[#allocation12 + $0x8] sm:$0xff]   ;;  %v1483_v41 = vld [vmem:[#allocation12] sm:$0xff]   ;;  %v1484_v42 = vld [vmem:[#allocation12 + $0x78] sm:$0xff]  }
  0x54   :  { %v1485_v43 = vld [vmem:[#allocation12 + $0x70] sm:$0xff]   ;;  %v1486_v44 = vld [vmem:[#allocation12 + $0x68] sm:$0xff]   ;;  %v1487_v45 = vld [vmem:[#allocation12 + $0x60] sm:$0xff]  }
  0x55   :  { %1311 = vmatpush3.bf16.msra.mxu0 %v1461_v6  ;;  %v1488_v46 = vld [vmem:[#allocation12 + $0x58] sm:$0xff]   ;;  %v1489_v47 = vld [vmem:[#allocation12 + $0x50] sm:$0xff]   ;;  %v1148_v49 = vld [vmem:[%s1899_s6] ss:$0 sm:$0xff] }
  0x56   :  { %1312 = vmatprep.subr.bf16.mxu0 %v1684_v0  ;;  %1293 = vmatpush3.bf16.msra.mxu1 %v1466_v9  ;;  %v1490_v57 = vld [vmem:[#allocation12 + $0x48] sm:$0xff]   ;;  %v1491_v58 = vld [vmem:[#allocation12 + $0x40] sm:$0xff]   ;;  %v1492_v59 = vld [vmem:[#allocation12 + $0xb8] sm:$0xff]  }
  0x57   :  { %1294 = vmatprep.subr.bf16.mxu1 %v1684_v0  ;;  %v1493_v60 = vld [vmem:[#allocation12 + $0xb0] sm:$0xff]   ;;  %v1494_v61 = vld [vmem:[#allocation12 + $0xa8] sm:$0xff]   ;;  %v1495_v62 = vld [vmem:[#allocation12 + $0xa0] sm:$0xff]  }
  0x58   :  { %v1496_v63 = vld [vmem:[#allocation12 + $0x98] sm:$0xff]   ;;  %v1497_v1 = vld [vmem:[#allocation12 + $0x90] sm:$0xff]   ;;  %v1149_v2 = vld [vmem:[%s1901_s8] ss:$0 sm:$0xff] }
  0x59   :  { %1313 = vmatpush3.bf16.msra.mxu0 %v1463_v8  ;;  %v1159_v18 = vld [vmem:[%s1901_s8 + $0x1] ss:$0 sm:$0xff] }
  0x5a   :  { %1314 = vmatprep.subr.bf16.mxu0 %v1684_v0  ;;  %1295 = vmatpush3.bf16.msra.mxu1 %v1468_v12  ;;  %v1500_v12 = vld [vmem:[#allocation12 + $0xf8] sm:$0xff]  }
  0x5b   :  { %1296 = vmatprep.subr.bf16.mxu1 %v1684_v0 }
  0x5d   :  { %1315 = vmatpush3.bf16.msra.mxu0 %v1465_v10  ;;  %v1498_v10 = vld [vmem:[#allocation12 + $0x88] sm:$0xff]  }
  0x5e   :  { %1316 = vmatprep.subr.bf16.mxu0 %v1684_v0  ;;  %1297 = vmatpush3.bf16.msra.mxu1 %v1470_v14  ;;  %v1502_v14 = vld [vmem:[#allocation12 + $0xe8] sm:$0xff]  }
  0x5f   :  { %1298 = vmatprep.subr.bf16.mxu1 %v1684_v0 }
  0x61   :  { %1317 = vmatpush3.bf16.msra.mxu0 %v1467_v11  ;;  %v1499_v11 = vld [vmem:[#allocation12 + $0x80] sm:$0xff]  }
  0x62   :  { %1318 = vmatprep.subr.bf16.mxu0 %v1684_v0  ;;  %1299 = vmatpush3.bf16.msra.mxu1 %v1472_v16  ;;  %v1504_v16 = vld [vmem:[#allocation12 + $0xd8] sm:$0xff]  }
  0x63   :  { %1300 = vmatprep.subr.bf16.mxu1 %v1684_v0 }
  0x65   :  { %1319 = vmatpush3.bf16.msra.mxu0 %v1469_v13  ;;  %v1501_v13 = vld [vmem:[#allocation12 + $0xf0] sm:$0xff]  }
  0x66   :  { %1320 = vmatprep.subr.bf16.mxu0 %v1684_v0  ;;  %1301 = vmatpush3.bf16.msra.mxu1 %v1474_v19 }
  0x67   :  { %1302 = vmatprep.subr.bf16.mxu1 %v1684_v0 }
  0x69   :  { %1321 = vmatpush3.bf16.msra.mxu0 %v1471_v15  ;;  %v1503_v15 = vld [vmem:[#allocation12 + $0xe0] sm:$0xff]  }
  0x6a   :  { %1322 = vmatprep.subr.bf16.mxu0 %v1684_v0  ;;  %1303 = vmatpush3.bf16.msra.mxu1 %v1475_v21 }
  0x6b   :  { %1328 = vmatprep.subr.bf16.mxu1 %v1684_v0 }
  0x6d   :  { %1323 = vmatpush3.bf16.msra.mxu0 %v1473_v17  ;;  %v1505_v17 = vld [vmem:[#allocation12 + $0xd0] sm:$0xff]  }
  0x6e   :  { %1348 = vmatprep.subr.bf16.mxu0 %v1684_v0 }
  0x70   :  { %1325 = vmatmul.mubr.bf16.vlgmr.msra.gmra.mxu0 %v120_v20 }
  0x71   :  { %1364 = vmatprep.mubr.msk.bf16.mxu0 %vm1685_vm0, %v1684_v0  ;;  %1349 = vmatpush3.bf16.msra.mxu0 %v1484_v42  ;;  %v1514_v42 = vld [vmem:[#allocation12 + $0x108] sm:$0xff]  }
  0x72   :  { %1350 = vmatprep.subr.bf16.mxu0 %v1684_v0 }
  0x75   :  { %1351 = vmatpush3.bf16.msra.mxu0 %v1485_v43  ;;  %v1515_v43 = vld [vmem:[#allocation12 + $0x100] sm:$0xff]  }
  0x76   :  { %1352 = vmatprep.subr.bf16.mxu0 %v1684_v0 }
  0x79   :  { %1353 = vmatpush3.bf16.msra.mxu0 %v1486_v44  ;;  %v1516_v44 = vld [vmem:[#allocation12 + $0x178] sm:$0xff]  }
  0x7a   :  { %1354 = vmatprep.subr.bf16.mxu0 %v1684_v0 }
  0x7d   :  { %1355 = vmatpush3.bf16.msra.mxu0 %v1487_v45  ;;  %v1517_v45 = vld [vmem:[#allocation12 + $0x170] sm:$0xff]  }
  0x7e   :  { %1356 = vmatprep.subr.bf16.mxu0 %v1684_v0 }
  0x81   :  { %1357 = vmatpush3.bf16.msra.mxu0 %v1488_v46  ;;  %v1518_v46 = vld [vmem:[#allocation12 + $0x168] sm:$0xff]  }
  0x82   :  { %1358 = vmatprep.subr.bf16.mxu0 %v1684_v0 }
  0x85   :  { %1359 = vmatpush3.bf16.msra.mxu0 %v1489_v47  ;;  %v1519_v47 = vld [vmem:[#allocation12 + $0x160] sm:$0xff]  }
  0x86   :  { %1360 = vmatprep.subr.bf16.mxu0 %v1684_v0 }
  0x89   :  { %1361 = vmatpush3.bf16.msra.mxu0 %v1490_v57 }
  0x8a   :  { %1362 = vmatprep.subr.bf16.mxu0 %v1684_v0 }
  0x8d   :  { %1363 = vmatpush3.bf16.msra.mxu0 %v1491_v58  ;;  %v1522_v58 = vld [vmem:[#allocation12 + $0x148] sm:$0xff]  }
  0x8e   :  { %1388 = vmatprep.subr.bf16.mxu0 %v1684_v0 }
 0x110   :  { %v176_v23 = vpop.f32.mrf.mxu0 }
 0x111   :  { %v177_v24 = vadd.f32 %v1129_v22, %v176_v23 }
 0x112   :  { %v1286_v25 = vpop.f32.mrf.mxu0 }
 0x113   :  { %1524 = vtanh.f32 %v177_v24 }
 0x114   :  { %v179_v26 = vpop.f32.mrf.mxu0 }
 0x115   :  { %v1506_v26 = vld [vmem:[#allocation12 + $0xc8] sm:$0xff]  }
 0x116   :  { %v1287_v27 = vpop.f32.mrf.mxu0 }
 0x117   :  { %v1507_v27 = vld [vmem:[#allocation12 + $0xc0] sm:$0xff]  }
 0x120   :  { %v1525_v28 = vpop.eup %1524 }
 0x121   :  { %v199_v30 = vpack.c.bf16 %v1525_v28, %v1525_v28  ;;  %v1508_v28 = vld [vmem:[#allocation12 + $0x138] sm:$0xff]  }
 0x123   :  { %1305 = vmatmul.mubr.bf16.vlgmr.msra.gmra.mxu1 %v199_v30  ;;  %v1510_v30 = vld [vmem:[#allocation12 + $0x128] sm:$0xff]  }
 0x124   :  { %1329 = vmatpush3.bf16.msra.mxu1 %v1476_v29  ;;  %1344 = vmatprep.mubr.msk.bf16.mxu1 %vm1685_vm0, %v1684_v0  ;;  %v1509_v29 = vld [vmem:[#allocation12 + $0x130] sm:$0xff]  }
 0x125   :  { %1330 = vmatprep.subr.bf16.mxu1 %v1684_v0 }
 0x128   :  { %1331 = vmatpush3.bf16.msra.mxu1 %v1477_v31  ;;  %v1511_v31 = vld [vmem:[#allocation12 + $0x120] sm:$0xff]  }
 0x129   :  { %1332 = vmatprep.subr.bf16.mxu1 %v1684_v0 }
 0x12c   :  { %1333 = vmatpush3.bf16.msra.mxu1 %v1478_v32  ;;  %v1512_v32 = vld [vmem:[#allocation12 + $0x118] sm:$0xff]  }
 0x12d   :  { %1334 = vmatprep.subr.bf16.mxu1 %v1684_v0 }
 0x130   :  { %1335 = vmatpush3.bf16.msra.mxu1 %v1479_v33  ;;  %v386_v36 = vpop.f32.mrf.mxu0  ;;  %v1513_v33 = vld [vmem:[#allocation12 + $0x110] sm:$0xff]  }
 0x131   :  { %1336 = vmatprep.subr.bf16.mxu1 %v1684_v0 }
 0x132   :  { %v1326_v37 = vpop.f32.mrf.mxu0 }
 0x134   :  { %1337 = vmatpush3.bf16.msra.mxu1 %v1480_v34  ;;  %v389_v38 = vpop.f32.mrf.mxu0  ;;  %v1169_v34 = vld [vmem:[%s1901_s8 + $0x2] ss:$0 sm:$0xff] }
 0x135   :  { %1338 = vmatprep.subr.bf16.mxu1 %v1684_v0 }
 0x136   :  { %v1327_v39 = vpop.f32.mrf.mxu0 }
 0x138   :  { %1339 = vmatpush3.bf16.msra.mxu1 %v1481_v35 }
 0x139   :  { %1340 = vmatprep.subr.bf16.mxu1 %v1684_v0 }
 0x13c   :  { %1341 = vmatpush3.bf16.msra.mxu1 %v1482_v40 }
 0x13d   :  { %1342 = vmatprep.subr.bf16.mxu1 %v1684_v0 }
 0x140   :  { %1343 = vmatpush3.bf16.msra.mxu1 %v1483_v41 }
 0x141   :  { %1368 = vmatprep.subr.bf16.mxu1 %v1684_v0 }
 0x1e3   :  { %v298_v48 = vpop.f32.mrf.mxu1 }
 0x1e4   :  { %v387_v50 = vadd.f32 %v386_v36, %v298_v48  ;;  %v1520_v48 = vld [vmem:[#allocation12 + $0x158] sm:$0xff]  }
 0x1e5   :  { %v1306_v51 = vpop.f32.mrf.mxu1 }
 0x1e6   :  { %v399_v52 = vadd.f32 %v1148_v49, %v387_v50  ;;  %v1521_v49 = vld [vmem:[#allocation12 + $0x150] sm:$0xff]   ;;  %v1179_v50 = vld [vmem:[%s1901_s8 + $0x3] ss:$0 sm:$0xff] }
 0x1e7   :  { %v301_v53 = vpop.f32.mrf.mxu1 }
 0x1e8   :  { %v400_v54 = vmax.f32 %v399_v52, 0.0 }
 0x1e9   :  { %v1307_v55 = vpop.f32.mrf.mxu1 }
 0x1ea   :  { %v401_v56 = vpack.c.bf16 %v400_v54, %v400_v54 }
 0x1ec   :  { %1345 = vmatmul.mubr.bf16.vlgmr.msra.gmra.mxu1 %v401_v56 }
 0x1ed   :  { %1384 = vmatprep.mubr.msk.bf16.mxu1 %vm1685_vm0, %v1684_v0  ;;  %1369 = vmatpush3.bf16.msra.mxu1 %v1492_v59  ;;  %v1523_v59 = vld [vmem:[#allocation12 + $0x140] sm:$0xff]  }
 0x1ee   :  { %1370 = vmatprep.subr.bf16.mxu1 %v1684_v0 }
 0x1f1   :  { %1371 = vmatpush3.bf16.msra.mxu1 %v1493_v60  ;;  %v1189_v60 = vld [vmem:[%s1901_s8 + $0x4] ss:$0 sm:$0xff] }
 0x1f2   :  { %1372 = vmatprep.subr.bf16.mxu1 %v1684_v0 }
 0x1f5   :  { %1373 = vmatpush3.bf16.msra.mxu1 %v1494_v61 }
 0x1f6   :  { %1374 = vmatprep.subr.bf16.mxu1 %v1684_v0 }
 0x1f9   :  { %1375 = vmatpush3.bf16.msra.mxu1 %v1495_v62 }
 0x1fa   :  { %1376 = vmatprep.subr.bf16.mxu1 %v1684_v0 }
 0x1fd   :  { %1377 = vmatpush3.bf16.msra.mxu1 %v1496_v63 }
 0x1fe   :  { %1378 = vmatprep.subr.bf16.mxu1 %v1684_v0 }
 0x201   :  { %1379 = vmatpush3.bf16.msra.mxu1 %v1497_v1 }
 0x202   :  { %1380 = vmatprep.subr.bf16.mxu1 %v1684_v0 }
 0x205   :  { %1381 = vmatpush3.bf16.msra.mxu1 %v1498_v10 }
 0x206   :  { %1382 = vmatprep.subr.bf16.mxu1 %v1684_v0 }
 0x209   :  { %1383 = vmatpush3.bf16.msra.mxu1 %v1499_v11 }
 0x20a   :  { %1408 = vmatprep.subr.bf16.mxu1 %v1684_v0 }
 0x2ac   :  { %v507_v3 = vpop.f32.mrf.mxu1 }
 0x2ad   :  { %v508_v4 = vadd.f32 %v1149_v2, %v507_v3 }
 0x2ae   :  { %v1346_v5 = vpop.f32.mrf.mxu1 }
 0x2af   :  { %v513_v6 = vmax.f32 %v508_v4, 0.0  ;;  %v1091_v5 = vlaneseq }
 0x2b0   :  { %v510_v7 = vpop.f32.mrf.mxu1 }
 0x2b1   :  { %v514_v8 = vpack.c.bf16 %v513_v6, %v513_v6  ;;  %v1092_v6 = vshrl.u32 %v1091_v5, 7 }
 0x2b2   :  { %v1347_v9 = vpop.f32.mrf.mxu1 }
 0x2b3   :  { %1365 = vmatmul.mubr.bf16.vlgmr.msra.gmra.mxu0 %v514_v8  ;;  %v1093_v8 = vsub.s32 0, %v1092_v6  ;;  %v1199_v9 = vld [vmem:[%s1901_s8 + $0x5] ss:$0 sm:$0xff] }
 0x2b4   :  { %1404 = vmatprep.mubr.msk.bf16.mxu0 %vm1685_vm0, %v1684_v0  ;;  %1389 = vmatpush3.bf16.msra.mxu0 %v1500_v12 }
 0x2b5   :  { %1390 = vmatprep.subr.bf16.mxu0 %v1684_v0 }
 0x2b8   :  { %1391 = vmatpush3.bf16.msra.mxu0 %v1501_v13 }
 0x2b9   :  { %1392 = vmatprep.subr.bf16.mxu0 %v1684_v0 }
 0x2bc   :  { %1393 = vmatpush3.bf16.msra.mxu0 %v1502_v14 }
 0x2bd   :  { %1394 = vmatprep.subr.bf16.mxu0 %v1684_v0 }
 0x2c0   :  { %1395 = vmatpush3.bf16.msra.mxu0 %v1503_v15 }
 0x2c1   :  { %1396 = vmatprep.subr.bf16.mxu0 %v1684_v0 }
 0x2c4   :  { %1397 = vmatpush3.bf16.msra.mxu0 %v1504_v16 }
 0x2c5   :  { %1398 = vmatprep.subr.bf16.mxu0 %v1684_v0 }
 0x2c8   :  { %1399 = vmatpush3.bf16.msra.mxu0 %v1505_v17 }
 0x2c9   :  { %1400 = vmatprep.subr.bf16.mxu0 %v1684_v0 }
 0x2cc   :  { %1401 = vmatpush3.bf16.msra.mxu0 %v1506_v26 }
 0x2cd   :  { %1402 = vmatprep.subr.bf16.mxu0 %v1684_v0 }
 0x2d0   :  { %1403 = vmatpush3.bf16.msra.mxu0 %v1507_v27 }
 0x2d1   :  { %1428 = vmatprep.subr.bf16.mxu0 %v1684_v0 }
 0x373   :  { %v622_v19 = vpop.f32.mrf.mxu0 }
 0x374   :  { %v623_v20 = vadd.f32 %v1159_v18, %v622_v19  ;;  %v1103_v18 = vand.u32 127, %v1091_v5  ;;  %v1099_v19 = vstv %s1903_s10 }
 0x375   :  { %v1366_v21 = vpop.f32.mrf.mxu0 }
 0x376   :  { %v628_v22 = vmax.f32 %v623_v20, 0.0  ;;  %v1106_v20 = vsub.s32 %v1103_v18, %v1092_v6 }
 0x377   :  { %v625_v23 = vpop.f32.mrf.mxu0 }
 0x378   :  { %v629_v24 = vpack.c.bf16 %v628_v22, %v628_v22 }
 0x379   :  { %v1367_v25 = vpop.f32.mrf.mxu0 }
 0x37a   :  { %1385 = vmatmul.mubr.bf16.vlgmr.msra.gmra.mxu1 %v629_v24 }
 0x37b   :  { %1424 = vmatprep.mubr.msk.bf16.mxu1 %vm1685_vm0, %v1684_v0  ;;  %1409 = vmatpush3.bf16.msra.mxu1 %v1508_v28 }
 0x37c   :  { %1410 = vmatprep.subr.bf16.mxu1 %v1684_v0 }
 0x37f   :  { %1411 = vmatpush3.bf16.msra.mxu1 %v1509_v29 }
 0x380   :  { %1412 = vmatprep.subr.bf16.mxu1 %v1684_v0 }
 0x383   :  { %1413 = vmatpush3.bf16.msra.mxu1 %v1510_v30 }
 0x384   :  { %1414 = vmatprep.subr.bf16.mxu1 %v1684_v0 }
 0x387   :  { %1415 = vmatpush3.bf16.msra.mxu1 %v1511_v31 }
 0x388   :  { %1416 = vmatprep.subr.bf16.mxu1 %v1684_v0 }
 0x38b   :  { %1417 = vmatpush3.bf16.msra.mxu1 %v1512_v32 }
 0x38c   :  { %1418 = vmatprep.subr.bf16.mxu1 %v1684_v0 }
 0x38f   :  { %1419 = vmatpush3.bf16.msra.mxu1 %v1513_v33 }
 0x390   :  { %1420 = vmatprep.subr.bf16.mxu1 %v1684_v0 }
 0x393   :  { %1421 = vmatpush3.bf16.msra.mxu1 %v1514_v42 }
 0x394   :  { %1422 = vmatprep.subr.bf16.mxu1 %v1684_v0 }
 0x397   :  { %1423 = vmatpush3.bf16.msra.mxu1 %v1515_v43 }
 0x43a   :  { %v737_v35 = vpop.f32.mrf.mxu1 }
 0x43b   :  { %v738_v36 = vadd.f32 %v1169_v34, %v737_v35 }
 0x43c   :  { %v1386_v37 = vpop.f32.mrf.mxu1 }
 0x43d   :  { %v743_v38 = vmax.f32 %v738_v36, 0.0 }
 0x43e   :  { %v740_v39 = vpop.f32.mrf.mxu1 }
 0x43f   :  { %v744_v40 = vpack.c.bf16 %v743_v38, %v743_v38 }
 0x440   :  { %v1387_v41 = vpop.f32.mrf.mxu1 }
 0x441   :  { %1405 = vmatmul.mubr.bf16.vlgmr.msra.gmra.mxu0 %v744_v40 }
 0x442   :  { %1444 = vmatprep.mubr.msk.bf16.mxu0 %vm1685_vm0, %v1684_v0  ;;  %1429 = vmatpush3.bf16.msra.mxu0 %v1516_v44 }
 0x443   :  { %1430 = vmatprep.subr.bf16.mxu0 %v1684_v0 }
 0x446   :  { %1431 = vmatpush3.bf16.msra.mxu0 %v1517_v45 }
 0x447   :  { %1432 = vmatprep.subr.bf16.mxu0 %v1684_v0 }
 0x44a   :  { %1433 = vmatpush3.bf16.msra.mxu0 %v1518_v46 }
 0x44b   :  { %1434 = vmatprep.subr.bf16.mxu0 %v1684_v0 }
 0x44e   :  { %1435 = vmatpush3.bf16.msra.mxu0 %v1519_v47 }
 0x44f   :  { %1436 = vmatprep.subr.bf16.mxu0 %v1684_v0 }
 0x452   :  { %1437 = vmatpush3.bf16.msra.mxu0 %v1520_v48 }
 0x453   :  { %1438 = vmatprep.subr.bf16.mxu0 %v1684_v0 }
 0x456   :  { %1439 = vmatpush3.bf16.msra.mxu0 %v1521_v49 }
 0x457   :  { %1440 = vmatprep.subr.bf16.mxu0 %v1684_v0 }
 0x45a   :  { %1441 = vmatpush3.bf16.msra.mxu0 %v1522_v58 }
 0x45b   :  { %1442 = vmatprep.subr.bf16.mxu0 %v1684_v0  ;;  %v1089_v0 = vld [vmem:[%s1902_s9] sm:$0x1]  ;;  %s1686_s9 = smov [#allocation14]  }
 0x45c   :  { %v1090_v7 = vunpack.c.l.bf16 %v1089_v0  ;;  %s1117_s20 = sshll.u32 %s1686_s9, 4  ;;  %s1118_s20 = int_to_ptr.vmem [resolvable:$true] %s1117_s20 }
 0x45d   :  { %s1646_s8 = scalar_lea.vmem %s1118_s20, 16  ;;  %s1650_s21 = scalar_lea.vmem %s1118_s20, 32 }
 0x45e   :  { %1443 = vmatpush3.bf16.msra.mxu0 %v1523_v59  ;;  %v1094_v12 = vrot.slane %v1090_v7, %v1093_v8  ;;  %p1647_p2 = scmp.ne.s32.totalorder %s1118_s20, %s1646_s8  ;;  %p1651_p3 = scmp.lt.s32.totalorder %s1118_s20, %s1118_s20 }
 0x45f   :  { %p1652_p4 = scmp.lt.s32.totalorder %s1650_s21, %s1646_s8 }
 0x461   :  { %p1653_p5 = por %p1652_p4, %p1651_p3 }
 0x463   :  { %p1654_p6 = pnand %p1653_p5, %p1647_p2 }
 0x501   :  { %v852_v51 = vpop.f32.mrf.mxu0 }
 0x502   :  { %v853_v52 = vadd.f32 %v1179_v50, %v852_v51 }
 0x503   :  { %v1406_v53 = vpop.f32.mrf.mxu0 }
 0x504   :  { %v858_v54 = vmax.f32 %v853_v52, 0.0 }
 0x505   :  { %v855_v55 = vpop.f32.mrf.mxu0 }
 0x506   :  { %v859_v56 = vpack.c.bf16 %v858_v54, %v858_v54 }
 0x507   :  { %v1407_v57 = vpop.f32.mrf.mxu0 }
 0x508   :  { %1425 = vmatmul.mubr.bf16.vlgmr.msra.gmra.mxu1 %v859_v56 }
 0x5c8   :  { %v967_v61 = vpop.f32.mrf.mxu1 }
 0x5c9   :  { %v968_v62 = vadd.f32 %v1189_v60, %v967_v61 }
 0x5ca   :  { %v1426_v63 = vpop.f32.mrf.mxu1 }
 0x5cb   :  { %v973_v1 = vmax.f32 %v968_v62, 0.0 }
 0x5cc   :  { %v970_v2 = vpop.f32.mrf.mxu1 }
 0x5cd   :  { %v974_v3 = vpack.c.bf16 %v973_v1, %v973_v1 }
 0x5ce   :  { %v1427_v4 = vpop.f32.mrf.mxu1 }
 0x5cf   :  { %1445 = vmatmul.mubr.bf16.vlgmr.msra.gmra.mxu0 %v974_v3 }
 0x68f   :  { %v1082_v10 = vpop.f32.mrf.mxu0 }
 0x690   :  { %v1083_v11 = vadd.f32 %v1199_v9, %v1082_v10 }
 0x691   :  { %v1446_v13 = vpop.f32.mrf.mxu0 }
 0x692   :  { %v1088_v14 = vmax.f32 %v1083_v11, 0.0 }
 0x693   :  { %v1085_v15 = vpop.f32.mrf.mxu0 }
 0x694   :  { %v1095_v16 = vmul.f32 %v1094_v12, %v1088_v14 }
 0x695   :  { %v1447_v17 = vpop.f32.mrf.mxu0 }
 0x696   :  { %1096 = vadd.xlane.f32.xlu0 %v1095_v16 }
 0x71f   :  { %v1097_v21 = vpop.xlane.xlu0 %1096 }
 0x720   :  { %v1100_v22 = vadd.f32 %v1099_v19, %v1097_v21 }
 0x722   :  { %v1107_v23 = vrot.slane %v1100_v22, %v1106_v20 }
 0x724   :  { %1110 = vst.msk [vmem:[#allocation14] sm:$0x1] %vm1109_vm2, %v1107_v23 }
 0x725   :  { %1657 = shalt.err (!%p1654_p6)
}
 0x726   :  { %1120 = dma.vmem_to_hbm [thread:$0]  %s1118_s20, 16, %s1904_s11, [#allocation5]  }
 0x727   :  { %1674 = dma.done.wait [#allocation5], 16  }
 0x728   :  { %1675 = vsyncadd [#allocation5], 4294967280 }
 0x729   :  { %1124 = vsyncpa [#allocation4], 1 }
 0x72a   :  { %1125 = vsyncpa [#allocation7], 1 }
 0x72b   :  { %1126 = vsyncpa [#allocation10], 1 }
 0x72c   :  { %1127 = vsyncpa [#allocation13], 1 }
 0x72d   :  { %1128 = vsyncpa [#allocation5], 1 }

</bundles_post_ra>
